<compile_context>
chip_gen: v7x
topology: tpu7x:2x2x1
jax: 0.10.0
libtpu: 0.0.40
codegen_flags: <defaults>
</compile_context>

<pallas_src>
import math
from functools import partial

import jax
import jax.numpy as jnp
import numpy as np
from jax.experimental import pallas as pl
from jax.experimental.pallas import tpu as pltpu


# -----------------------------------------------------------------------------------
# Pass 1: fused QKV projection + RMS-norm + RoPE (+ scale on Q, + K transpose),
# computed ONCE over the sequence (hoisted out of the per-query-tile attention grid).
# -----------------------------------------------------------------------------------
def _qkv_prep_kernel(x_ref, wqkvT_ref, cos_ref, sin_ref,
                     q_ref, kt_ref, v_ref, qkv_scr,
                     *, D, n_heads, d_head, eps, scale):
    half = d_head // 2

    # One wide projection (M=TL, K=D, N=3D) on the MXU; stage the result in bf16 VMEM
    # scratch so the head loop below re-reads small slices instead of keeping a
    # (TL, 3D) f32 value live across the whole unrolled loop (vreg-spill relief).
    qkv_scr[...] = jnp.dot(x_ref[...], wqkvT_ref[...],
                           preferred_element_type=jnp.float32).astype(qkv_scr.dtype)

    # V is untouched by norm / rope: copy straight through.
    v_ref[...] = qkv_scr[:, 2 * D:]

    c, s = cos_ref[...], sin_ref[...]                              # (TL, d_head) f32

    # TODO(synk): for n_heads >> 4 replace this static unroll with a batched
    # (TL, H, d_head) formulation to keep instruction count / vreg pressure flat.
    for h in range(n_heads):
        lo = h * d_head
        qh = qkv_scr[:, lo:lo + d_head].astype(jnp.float32)        # (TL, d_head)
        kh = qkv_scr[:, D + lo:D + lo + d_head].astype(jnp.float32)

        # RMS-norm over the head dim (torch F.rms_norm, no learnable scale), f32 VPU.
        qh = qh * jax.lax.rsqrt(jnp.mean(qh * qh, axis=-1, keepdims=True) + eps)
        kh = kh * jax.lax.rsqrt(jnp.mean(kh * kh, axis=-1, keepdims=True) + eps)

        # Rotary via XLU roll: partner = halves-swapped tensor; tables are [c,c]/[s,-s].
        qh = qh * c + pltpu.roll(qh, shift=half, axis=1) * s
        kh = kh * c + pltpu.roll(kh, shift=half, axis=1) * s

        # 1/sqrt(d_head) folded into Q once (L x d_head), never into (L x L) scores.
        q_ref[:, lo:lo + d_head] = (qh * scale).astype(q_ref.dtype)
        # K stored pre-transposed (d_head, L): the per-tile QK^T becomes a plain
        # K-major contraction with no per-head/per-tile XLU transpose.
        kt_ref[lo:lo + d_head, :] = kh.T.astype(kt_ref.dtype)


# -----------------------------------------------------------------------------------
# Pass 2: per-query-tile attention (scores, softmax, p@V) + single fused Wo matmul.
# -----------------------------------------------------------------------------------
def _attn_kernel(q_ref, kt_ref, v_ref, woT_ref, o_ref, y_scr, *, n_heads, d_head):
    for h in range(n_heads):
        lo = h * d_head
        qh = q_ref[:, lo:lo + d_head]              # (TQ, d_head) bf16, normed+rope'd+scaled
        kth = kt_ref[lo:lo + d_head, :]            # (d_head, L)  bf16, normed+rope'd K^T
        vh = v_ref[:, lo:lo + d_head]              # (L,  d_head) bf16

        # Scores on the MXU, plain K-major contraction (no transpose in this kernel).
        sc = jnp.dot(qh, kth, preferred_element_type=jnp.float32)  # (TQ, L) f32

        # Max-stabilized softmax (f32 VPU); denominator folded into the small
        # (TQ, d_head) head output via the EUP reciprocal instead of dividing probs.
        m = jnp.max(sc, axis=-1, keepdims=True)
        p = jnp.exp(sc - m)
        r = jnp.sum(p, axis=-1, keepdims=True)
        yh = jnp.dot(p.astype(jnp.bfloat16), vh,
                     preferred_element_type=jnp.float32)           # (TQ, d_head) f32
        # NOTE: approx=True injects ~1e-3 rel error into each output row (flagged in
        # review); set approx=False for exact production numerics.
        y_scr[:, lo:lo + d_head] = (yh * pl.reciprocal(r, approx=True)).astype(y_scr.dtype)

    # Output projection: ONE K=D matmul over the concatenated heads (from VMEM scratch).
    o_ref[...] = jnp.dot(y_scr[...], woT_ref[...],
                         preferred_element_type=jnp.float32).astype(o_ref.dtype)


def prepare_attention_params(wq, wk, wv, wo, seq_len, n_heads, base=10000.0):
    """One-time weight/table prep (transpose + fuse + bf16 cast); not redone per call."""
    D = wq.shape[0]
    d_head = D // n_heads
    # Fused [Wq | Wk | Wv]^T in the x @ W^T convention, bf16 operands for the MXU.
    wqkvT = jnp.concatenate([wq.T, wk.T, wv.T], axis=1).astype(jnp.bfloat16)   # (D, 3D)
    woT = wo.T.astype(jnp.bfloat16)                                            # (D, D)
    # Rotary tables, pre-tiled to full head width: [cos, cos] and [sin, -sin].
    inv_freq = (1.0 / base) ** (jnp.arange(0, d_head, 2, dtype=jnp.float32) / d_head)
    t = jnp.arange(seq_len, dtype=jnp.float32)
    freqs = jnp.outer(t, inv_freq)                                 # (L, d_head // 2)
    cos, sin = jnp.cos(freqs), jnp.sin(freqs)
    cos_full = jnp.concatenate([cos, cos], axis=-1)                # (L, d_head)
    sin_signed = jnp.concatenate([sin, -sin], axis=-1)             # (L, d_head)
    return wqkvT, woT, cos_full, sin_signed


def _vmem_limit_bytes(block_nbytes, headroom=8 << 20):
    """Budget = double-buffered pipeline blocks + headroom, capped under v7x's 64 MiB."""
    need = 2 * sum(block_nbytes) + headroom
    return int(min(max(need, 16 << 20), 64 << 20))


def self_attention_forward(x, params, n_heads):
    """x: (L, D) float. params from prepare_attention_params."""
    wqkvT, woT, cos_full, sin_signed = params
    L, D = x.shape
    d_head = D // n_heads
    assert D % n_heads == 0 and d_head % 2 == 0
    assert d_head % 128 == 0, "lane-aligned head dim assumed (config: d_head=128)"
    eps = float(jnp.finfo(jnp.float32).eps)        # torch F.rms_norm default eps (f32)
    scale = 1.0 / math.sqrt(d_head)                # flex_attention default scale
    bf16 = jnp.bfloat16
    xb = x.astype(bf16)                            # MXU operand dtype; VPU math stays f32

    # ------------------ Pass 1: Q / K^T / V materialized once ----------------------
    TL = min(L, 128)
    assert L % TL == 0 and TL % 8 == 0
    prep_blocks = [TL * D * 2, D * 3 * D * 2, TL * d_head * 4, TL * d_head * 4,
                   TL * D * 2, D * TL * 2, TL * D * 2, TL * 3 * D * 2]
    prep_call = pl.pallas_call(
        partial(_qkv_prep_kernel, D=D, n_heads=n_heads, d_head=d_head,
                eps=eps, scale=scale),
        out_shape=(jax.ShapeDtypeStruct((L, D), bf16),     # Q (normed, rope'd, scaled)
                   jax.ShapeDtypeStruct((D, L), bf16),     # K^T (normed, rope'd)
                   jax.ShapeDtypeStruct((L, D), bf16)),    # V
        grid=(L // TL,),
        in_specs=[
            pl.BlockSpec((TL, D), lambda i: (i, 0)),       # x rows for this tile
            pl.BlockSpec((D, 3 * D), lambda i: (0, 0)),    # fused [Wq|Wk|Wv]^T, resident
            pl.BlockSpec((TL, d_head), lambda i: (i, 0)),  # cos rows
            pl.BlockSpec((TL, d_head), lambda i: (i, 0)),  # sin rows
        ],
        out_specs=(
            pl.BlockSpec((TL, D), lambda i: (i, 0)),
            pl.BlockSpec((D, TL), lambda i: (0, i)),
            pl.BlockSpec((TL, D), lambda i: (i, 0)),
        ),
        scratch_shapes=[pltpu.VMEM((TL, 3 * D), bf16)],
        compiler_params=pltpu.CompilerParams(
            dimension_semantics=("parallel",),
            vmem_limit_bytes=_vmem_limit_bytes(prep_blocks)),
    )
    q, kt, v = prep_call(xb, wqkvT, cos_full, sin_signed)

    # ------------------ Pass 2: attention + Wo over query tiles ---------------------
    # >= 2 grid steps even at L=128 so v7x's second TensorCore gets work; TQ=128 once
    # L >= 256 (full 128x128 MXU fit on v5e, fewer per-step overheads elsewhere).
    TQ = 128 if L >= 256 else max(L // 2, 8)
    assert L % TQ == 0 and TQ % 8 == 0
    out_itemsize = jnp.dtype(x.dtype).itemsize
    attn_blocks = [TQ * D * 2, D * L * 2, L * D * 2, D * D * 2,
                   TQ * D * out_itemsize, TQ * D * 2]
    attn_call = pl.pallas_call(
        partial(_attn_kernel, n_heads=n_heads, d_head=d_head),
        out_shape=jax.ShapeDtypeStruct((L, D), x.dtype),
        grid=(L // TQ,),
        in_specs=[
            pl.BlockSpec((TQ, D), lambda i: (i, 0)),       # Q rows of this query tile
            pl.BlockSpec((D, L), lambda i: (0, 0)),        # K^T, VMEM-resident
            pl.BlockSpec((L, D), lambda i: (0, 0)),        # V, VMEM-resident
            pl.BlockSpec((D, D), lambda i: (0, 0)),        # Wo^T, VMEM-resident
        ],
        out_specs=pl.BlockSpec((TQ, D), lambda i: (i, 0)),
        scratch_shapes=[pltpu.VMEM((TQ, D), bf16)],        # concatenated head outputs
        compiler_params=pltpu.CompilerParams(
            dimension_semantics=("parallel",),             # q tiles split across TCs
            vmem_limit_bytes=_vmem_limit_bytes(attn_blocks)),
    )
    return attn_call(q, kt, v, woT)


def reference_forward(x, wq, wk, wv, wo, n_heads, base=10000.0):
    """Pure-JAX f32 re-implementation of the PyTorch forward (correctness check)."""
    L, D = x.shape
    d_head = D // n_heads
    q = (x @ wq.T).reshape(L, n_heads, d_head)
    k = (x @ wk.T).reshape(L, n_heads, d_head)
    v = (x @ wv.T).reshape(L, n_heads, d_head)
    eps = float(jnp.finfo(jnp.float32).eps)
    rms = lambda a: a * jax.lax.rsqrt(jnp.mean(a * a, axis=-1, keepdims=True) + eps)
    q, k = rms(q), rms(k)
    inv_freq = (1.0 / base) ** (jnp.arange(0, d_head, 2, dtype=jnp.float32) / d_head)
    freqs = jnp.outer(jnp.arange(L, dtype=jnp.float32), inv_freq)
    cos, sin = jnp.cos(freqs)[:, None, :], jnp.sin(freqs)[:, None, :]

    def rope(a):
        a1, a2 = a[..., :d_head // 2], a[..., d_head // 2:]
        return jnp.concatenate([a1 * cos + a2 * sin, -a1 * sin + a2 * cos], axis=-1)

    q, k = rope(q), rope(k)
    s = jnp.einsum('lhd,mhd->hlm', q, k) / math.sqrt(d_head)
    p = jax.nn.softmax(s, axis=-1)
    y = jnp.einsum('hlm,mhd->lhd', p, v).reshape(L, D)
    return y @ wo.T


if __name__ == "__main__":
    # hidden_size=256, num_attention_heads=2 -> d_head=128 (lane-aligned), seq_len=128
    L, D, N_HEADS = 128, 256, 2
    key = jax.random.PRNGKey(0)
    kx, kq, kk, kv, ko = jax.random.split(key, 5)

    x = jax.random.normal(kx, (L, D), dtype=jnp.float32)
    wq = 0.02 * jax.random.normal(kq, (D, D), dtype=jnp.float32)
    wk = 0.02 * jax.random.normal(kk, (D, D), dtype=jnp.float32)
    wv = 0.02 * jax.random.normal(kv, (D, D), dtype=jnp.float32)
    wo = 0.02 * jax.random.normal(ko, (D, D), dtype=jnp.float32)  # ref zero-inits; random here

    params = prepare_attention_params(wq, wk, wv, wo, L, N_HEADS)
    out = self_attention_forward(x, params, N_HEADS)
    out = jax.block_until_ready(out)

    ref = reference_forward(x, wq, wk, wv, wo, N_HEADS)
    # bf16 MXU operands + bf16 VMEM staging + approx EUP reciprocal vs. a pure-f32
    # reference: tolerance sized to absorb mixed-precision rounding while still catching
    # structural bugs (which show up at ~10-100x these bounds).
    np.testing.assert_allclose(np.asarray(out), np.asarray(ref), rtol=5e-2, atol=5e-3)

    print("KERNEL_OK")
</pallas_src>

<mosaic_0001>
module attributes {stable_mosaic.version = 11 : i64} {
  func.func @_qkv_prep_kernel(%arg0: i32, %arg1: memref<128x256xbf16, #tpu.memory_space<vmem>>, %arg2: memref<256x768xbf16, #tpu.memory_space<vmem>>, %arg3: memref<128x128xf32, #tpu.memory_space<vmem>>, %arg4: memref<128x128xf32, #tpu.memory_space<vmem>>, %arg5: memref<128x256xbf16, #tpu.memory_space<vmem>>, %arg6: memref<256x128xbf16, #tpu.memory_space<vmem>>, %arg7: memref<128x256xbf16, #tpu.memory_space<vmem>>, %arg8: memref<128x768xbf16, #tpu.memory_space<vmem>>) attributes {dimension_semantics = [#tpu.dimension_semantics<parallel>], iteration_bounds = array<i64: 1>, scalar_prefetch = 0 : i64, scratch_operands = 1 : i64, tpu.core_type = #tpu.core_type<tc>, window_params = [{transform_indices = @transform_0, window_bounds = array<i64: 128, 256>}, {pipeline_mode = #tpu.pipeline_mode<synchronous>, transform_indices = @transform_1, window_bounds = array<i64: 256, 768>}, {transform_indices = @transform_2, window_bounds = array<i64: 128, 128>}, {transform_indices = @transform_3, window_bounds = array<i64: 128, 128>}, {transform_indices = @transform_4, window_bounds = array<i64: 128, 256>}, {transform_indices = @transform_5, window_bounds = array<i64: 256, 128>}, {transform_indices = @transform_6, window_bounds = array<i64: 128, 256>}]} {
    %c0 = arith.constant 0 : index
    %c0_0 = arith.constant 0 : index
    %0 = vector.load %arg1[%c0, %c0_0] : memref<128x256xbf16, #tpu.memory_space<vmem>>, vector<128x256xbf16>
    %c0_1 = arith.constant 0 : index
    %c0_2 = arith.constant 0 : index
    %1 = vector.load %arg2[%c0_1, %c0_2] : memref<256x768xbf16, #tpu.memory_space<vmem>>, vector<256x768xbf16>
    %cst = arith.constant dense<0.000000e+00> : vector<128x768xf32>
    %2 = tpu.matmul %0, %1, %cst {dimension_numbers = #tpu.dot_dimension_numbers<[1], [0], [0], [1], [0, 0, 1, 1], [], []>} : vector<128x256xbf16>, vector<256x768xbf16>, vector<128x768xf32> -> vector<128x768xf32>
    %3 = arith.truncf %2 : vector<128x768xf32> to vector<128x768xbf16>
    %c0_3 = arith.constant 0 : index
    %c0_4 = arith.constant 0 : index
    %4 = vector.load %arg8[%c0_3, %c0_4] : memref<128x768xbf16, #tpu.memory_space<vmem>>, vector<128x768xbf16>
    tpu.vector_store %arg8[%c0_3, %c0_4], %3 {strides = array<i32>} : memref<128x768xbf16, #tpu.memory_space<vmem>>, vector<128x768xbf16>,
    %c0_5 = arith.constant 0 : index
    %c512 = arith.constant 512 : index
    %5 = vector.load %arg8[%c0_5, %c512] : memref<128x768xbf16, #tpu.memory_space<vmem>>, vector<128x256xbf16>
    %c0_6 = arith.constant 0 : index
    %c0_7 = arith.constant 0 : index
    %6 = vector.load %arg7[%c0_6, %c0_7] : memref<128x256xbf16, #tpu.memory_space<vmem>>, vector<128x256xbf16>
    tpu.vector_store %arg7[%c0_6, %c0_7], %5 {strides = array<i32>} : memref<128x256xbf16, #tpu.memory_space<vmem>>, vector<128x256xbf16>,
    %c0_8 = arith.constant 0 : index
    %c0_9 = arith.constant 0 : index
    %7 = vector.load %arg3[%c0_8, %c0_9] : memref<128x128xf32, #tpu.memory_space<vmem>>, vector<128x128xf32>
    %c0_10 = arith.constant 0 : index
    %c0_11 = arith.constant 0 : index
    %8 = vector.load %arg4[%c0_10, %c0_11] : memref<128x128xf32, #tpu.memory_space<vmem>>, vector<128x128xf32>
    %c0_12 = arith.constant 0 : index
    %c0_13 = arith.constant 0 : index
    %9 = vector.load %arg8[%c0_12, %c0_13] : memref<128x768xbf16, #tpu.memory_space<vmem>>, vector<128x128xbf16>
    %10 = arith.extf %9 : vector<128x128xbf16> to vector<128x128xf32>
    %c0_14 = arith.constant 0 : index
    %c256 = arith.constant 256 : index
    %11 = vector.load %arg8[%c0_14, %c256] : memref<128x768xbf16, #tpu.memory_space<vmem>>, vector<128x128xbf16>
    %12 = arith.extf %11 : vector<128x128xbf16> to vector<128x128xf32>
    %13 = arith.mulf %10, %10 : vector<128x128xf32>
    %cst_15 = arith.constant dense<0.000000e+00> : vector<128xf32>
    %14 = vector.multi_reduction <add>, %13, %cst_15 [1] : vector<128x128xf32> to vector<128xf32>
    %15 = vector.shape_cast %14 : vector<128xf32> to vector<128x1xf32>
    %cst_16 = arith.constant 1.280000e+02 : f32
    %16 = vector.broadcast %cst_16 : f32 to vector<128x1xf32>
    %17 = arith.divf %15, %16 : vector<128x1xf32>
    %cst_17 = arith.constant 1.1920929E-7 : f32
    %18 = vector.broadcast %cst_17 : f32 to vector<128x1xf32>
    %19 = arith.addf %17, %18 : vector<128x1xf32>
    %20 = math.rsqrt %19 : vector<128x1xf32>
    %21 = vector.broadcast %20 : vector<128x1xf32> to vector<128x128xf32>
    %22 = arith.mulf %10, %21 : vector<128x128xf32>
    %23 = arith.mulf %12, %12 : vector<128x128xf32>
    %cst_18 = arith.constant dense<0.000000e+00> : vector<128xf32>
    %24 = vector.multi_reduction <add>, %23, %cst_18 [1] : vector<128x128xf32> to vector<128xf32>
    %25 = vector.shape_cast %24 : vector<128xf32> to vector<128x1xf32>
    %cst_19 = arith.constant 1.280000e+02 : f32
    %26 = vector.broadcast %cst_19 : f32 to vector<128x1xf32>
    %27 = arith.divf %25, %26 : vector<128x1xf32>
    %cst_20 = arith.constant 1.1920929E-7 : f32
    %28 = vector.broadcast %cst_20 : f32 to vector<128x1xf32>
    %29 = arith.addf %27, %28 : vector<128x1xf32>
    %30 = math.rsqrt %29 : vector<128x1xf32>
    %31 = vector.broadcast %30 : vector<128x1xf32> to vector<128x128xf32>
    %32 = arith.mulf %12, %31 : vector<128x128xf32>
    %33 = arith.mulf %22, %7 : vector<128x128xf32>
    %c64_i32 = arith.constant 64 : i32
    %34 = tpu.dynamic_rotate %22 by %c64_i32 dim 1 : vector<128x128xf32>, i32 -> vector<128x128xf32>
    %35 = arith.mulf %34, %8 : vector<128x128xf32>
    %36 = arith.addf %33, %35 : vector<128x128xf32>
    %37 = arith.mulf %32, %7 : vector<128x128xf32>
    %c64_i32_21 = arith.constant 64 : i32
    %38 = tpu.dynamic_rotate %32 by %c64_i32_21 dim 1 : vector<128x128xf32>, i32 -> vector<128x128xf32>
    %39 = arith.mulf %38, %8 : vector<128x128xf32>
    %40 = arith.addf %37, %39 : vector<128x128xf32>
    %cst_22 = arith.constant 0.0883883461 : f32
    %41 = vector.broadcast %cst_22 : f32 to vector<128x128xf32>
    %42 = arith.mulf %36, %41 : vector<128x128xf32>
    %43 = arith.truncf %42 : vector<128x128xf32> to vector<128x128xbf16>
    %c0_23 = arith.constant 0 : index
    %c0_24 = arith.constant 0 : index
    %44 = vector.load %arg5[%c0_23, %c0_24] : memref<128x256xbf16, #tpu.memory_space<vmem>>, vector<128x128xbf16>
    tpu.vector_store %arg5[%c0_23, %c0_24], %43 {strides = array<i32>} : memref<128x256xbf16, #tpu.memory_space<vmem>>, vector<128x128xbf16>,
    %45 = tpu.transpose %40, [1, 0] : vector<128x128xf32> -> vector<128x128xf32>
    %46 = arith.truncf %45 : vector<128x128xf32> to vector<128x128xbf16>
    %c0_25 = arith.constant 0 : index
    %c0_26 = arith.constant 0 : index
    %47 = vector.load %arg6[%c0_25, %c0_26] : memref<256x128xbf16, #tpu.memory_space<vmem>>, vector<128x128xbf16>
    tpu.vector_store %arg6[%c0_25, %c0_26], %46 {strides = array<i32>} : memref<256x128xbf16, #tpu.memory_space<vmem>>, vector<128x128xbf16>,
    %c0_27 = arith.constant 0 : index
    %c128 = arith.constant 128 : index
    %48 = vector.load %arg8[%c0_27, %c128] : memref<128x768xbf16, #tpu.memory_space<vmem>>, vector<128x128xbf16>
    %49 = arith.extf %48 : vector<128x128xbf16> to vector<128x128xf32>
    %c0_28 = arith.constant 0 : index
    %c384 = arith.constant 384 : index
    %50 = vector.load %arg8[%c0_28, %c384] : memref<128x768xbf16, #tpu.memory_space<vmem>>, vector<128x128xbf16>
    %51 = arith.extf %50 : vector<128x128xbf16> to vector<128x128xf32>
    %52 = arith.mulf %49, %49 : vector<128x128xf32>
    %cst_29 = arith.constant dense<0.000000e+00> : vector<128xf32>
    %53 = vector.multi_reduction <add>, %52, %cst_29 [1] : vector<128x128xf32> to vector<128xf32>
    %54 = vector.shape_cast %53 : vector<128xf32> to vector<128x1xf32>
    %cst_30 = arith.constant 1.280000e+02 : f32
    %55 = vector.broadcast %cst_30 : f32 to vector<128x1xf32>
    %56 = arith.divf %54, %55 : vector<128x1xf32>
    %cst_31 = arith.constant 1.1920929E-7 : f32
    %57 = vector.broadcast %cst_31 : f32 to vector<128x1xf32>
    %58 = arith.addf %56, %57 : vector<128x1xf32>
    %59 = math.rsqrt %58 : vector<128x1xf32>
    %60 = vector.broadcast %59 : vector<128x1xf32> to vector<128x128xf32>
    %61 = arith.mulf %49, %60 : vector<128x128xf32>
    %62 = arith.mulf %51, %51 : vector<128x128xf32>
    %cst_32 = arith.constant dense<0.000000e+00> : vector<128xf32>
    %63 = vector.multi_reduction <add>, %62, %cst_32 [1] : vector<128x128xf32> to vector<128xf32>
    %64 = vector.shape_cast %63 : vector<128xf32> to vector<128x1xf32>
    %cst_33 = arith.constant 1.280000e+02 : f32
    %65 = vector.broadcast %cst_33 : f32 to vector<128x1xf32>
    %66 = arith.divf %64, %65 : vector<128x1xf32>
    %cst_34 = arith.constant 1.1920929E-7 : f32
    %67 = vector.broadcast %cst_34 : f32 to vector<128x1xf32>
    %68 = arith.addf %66, %67 : vector<128x1xf32>
    %69 = math.rsqrt %68 : vector<128x1xf32>
    %70 = vector.broadcast %69 : vector<128x1xf32> to vector<128x128xf32>
    %71 = arith.mulf %51, %70 : vector<128x128xf32>
    %72 = arith.mulf %61, %7 : vector<128x128xf32>
    %c64_i32_35 = arith.constant 64 : i32
    %73 = tpu.dynamic_rotate %61 by %c64_i32_35 dim 1 : vector<128x128xf32>, i32 -> vector<128x128xf32>
    %74 = arith.mulf %73, %8 : vector<128x128xf32>
    %75 = arith.addf %72, %74 : vector<128x128xf32>
    %76 = arith.mulf %71, %7 : vector<128x128xf32>
    %c64_i32_36 = arith.constant 64 : i32
    %77 = tpu.dynamic_rotate %71 by %c64_i32_36 dim 1 : vector<128x128xf32>, i32 -> vector<128x128xf32>
    %78 = arith.mulf %77, %8 : vector<128x128xf32>
    %79 = arith.addf %76, %78 : vector<128x128xf32>
    %cst_37 = arith.constant 0.0883883461 : f32
    %80 = vector.broadcast %cst_37 : f32 to vector<128x128xf32>
    %81 = arith.mulf %75, %80 : vector<128x128xf32>
    %82 = arith.truncf %81 : vector<128x128xf32> to vector<128x128xbf16>
    %c0_38 = arith.constant 0 : index
    %c128_39 = arith.constant 128 : index
    %83 = vector.load %arg5[%c0_38, %c128_39] : memref<128x256xbf16, #tpu.memory_space<vmem>>, vector<128x128xbf16>
    tpu.vector_store %arg5[%c0_38, %c128_39], %82 {strides = array<i32>} : memref<128x256xbf16, #tpu.memory_space<vmem>>, vector<128x128xbf16>,
    %84 = tpu.transpose %79, [1, 0] : vector<128x128xf32> -> vector<128x128xf32>
    %85 = arith.truncf %84 : vector<128x128xf32> to vector<128x128xbf16>
    %c128_40 = arith.constant 128 : index
    %c0_41 = arith.constant 0 : index
    %86 = vector.load %arg6[%c128_40, %c0_41] : memref<256x128xbf16, #tpu.memory_space<vmem>>, vector<128x128xbf16>
    tpu.vector_store %arg6[%c128_40, %c0_41], %85 {strides = array<i32>} : memref<256x128xbf16, #tpu.memory_space<vmem>>, vector<128x128xbf16>,
    return
  }
  func.func @transform_0(%arg0: i32) -> (i32, i32) {
    %c0_i32 = arith.constant 0 : i32
    %c0_i32_0 = arith.constant 0 : i32
    return %arg0, %c0_i32 : i32, i32
  }
  func.func @transform_1(%arg0: i32) -> (i32, i32) {
    %c0_i32 = arith.constant 0 : i32
    %c0_i32_0 = arith.constant 0 : i32
    %c0_i32_1 = arith.constant 0 : i32
    return %c0_i32, %c0_i32_0 : i32, i32
  }
  func.func @transform_2(%arg0: i32) -> (i32, i32) {
    %c0_i32 = arith.constant 0 : i32
    %c0_i32_0 = arith.constant 0 : i32
    return %arg0, %c0_i32 : i32, i32
  }
  func.func @transform_3(%arg0: i32) -> (i32, i32) {
    %c0_i32 = arith.constant 0 : i32
    %c0_i32_0 = arith.constant 0 : i32
    return %arg0, %c0_i32 : i32, i32
  }
  func.func @transform_4(%arg0: i32) -> (i32, i32) {
    %c0_i32 = arith.constant 0 : i32
    %c0_i32_0 = arith.constant 0 : i32
    return %arg0, %c0_i32 : i32, i32
  }
  func.func @transform_5(%arg0: i32) -> (i32, i32) {
    %c0_i32 = arith.constant 0 : i32
    %c0_i32_0 = arith.constant 0 : i32
    return %c0_i32, %arg0 : i32, i32
  }
  func.func @transform_6(%arg0: i32) -> (i32, i32) {
    %c0_i32 = arith.constant 0 : i32
    %c0_i32_0 = arith.constant 0 : i32
    return %arg0, %c0_i32 : i32, i32
  }
}

</mosaic_0001>

<bundles_post_ra>
// kernel: tpu_custom_call.1
= control target key start
LH: loop header
LB: loop body
LE: loop exit
PB: predicated region body
PF: predicated region fallthrough
CT: control target
= control target key end

     0   :  { %12 = vsyncpa [#allocation4], 0  ;;  %s4710_s0 = inlined_call_operand.hbm [shape: bf16[128,256], index: 0, kind: input, shape index: {}]   ;;  %s4711_s1 = inlined_call_operand.hbm [shape: bf16[256,768], index: 1, kind: input, shape index: {}]   ;;  %s4712_s2 = inlined_call_operand.hbm [shape: f32[128,128], index: 2, kind: input, shape index: {}]   ;;  %s4713_s3 = inlined_call_operand.hbm [shape: f32[128,128], index: 3, kind: input, shape index: {}]   ;;  %s4714_s4 = inlined_call_operand.hbm [shape: bf16[128,256], index: 4, kind: output, shape index: {0}]   ;;  %s4715_s5 = inlined_call_operand.hbm [shape: bf16[256,128], index: 5, kind: output, shape index: {1}]   ;;  %s4716_s6 = inlined_call_operand.hbm [shape: bf16[128,256], index: 6, kind: output, shape index: {2}]  }
   0x1   :  { %13 = vsyncpa [#allocation7], 0 }
   0x2   :  { %14 = vsyncpa [#allocation10], 0 }
   0x3   :  { %15 = vsyncpa [#allocation5], 0 }
   0x4   :  { %16 = vsyncpa [#allocation13], 0  ;;  %s3555_s21 = smov [#allocation6]   ;;  %s3391_s25 = scalar_lea.hbm %s4711_s1, 12288 }
   0x5   :  { %s34_s22 = sshll.u32 %s3555_s21, 4  ;;  %p3392_p0 = scmp.ne.s32.totalorder %s4711_s1, %s3391_s25  ;;  %s35_s22 = int_to_ptr.vmem [resolvable:$true] %s34_s22 }
   0x6   :  { %p3395_p1 = scmp.lt.u32.totalorder %s3391_s25, %s4711_s1 }
   0x8   :  { %p3397_p2 = pnand %p3395_p1, %p3392_p0 }
   0xa   :  { %3400 = shalt.err (!%p3397_p2)
}
   0xb   :  { %s3401_s30 = scalar_lea.vmem %s35_s22, 12288  ;;  %p3406_p4 = scmp.lt.s32.totalorder %s35_s22, %s35_s22 }
   0xc   :  { %p3402_p3 = scmp.ne.s32.totalorder %s35_s22, %s3401_s30  ;;  %p3407_p5 = scmp.lt.s32.totalorder %s3401_s30, %s3401_s30 }
   0xe   :  { %p3408_p6 = por %p3407_p5, %p3406_p4 }
  0x10   :  { %p3409_p7 = pnand %p3408_p6, %p3402_p3 }
  0x12   :  { %3412 = shalt.err (!%p3409_p7)
}
  0x13   :  { %s3556_s7 = smov 384   ;;  %s3557_s8 = smov 24  }
  0x14   :  { %40 = dma.hbm_to_vmem [thread:$0]  %s4711_s1, 12288, %s35_s22, [#allocation7], %s3556_s7, %s3556_s7, %s3557_s8  }
  0x15   :  { %s3558_s11 = smov [#allocation3]   ;;  %s3413_s15 = scalar_lea.hbm %s4710_s0, 2048 }
  0x16   :  { %s22_s12 = sshll.u32 %s3558_s11, 4  ;;  %p3414_p8 = scmp.ne.s32.totalorder %s4710_s0, %s3413_s15  ;;  %s23_s12 = int_to_ptr.vmem [resolvable:$true] %s22_s12 }
  0x17   :  { %p3417_p9 = scmp.lt.u32.totalorder %s3413_s15, %s4710_s0 }
  0x19   :  { %p3419_p10 = pnand %p3417_p9, %p3414_p8 }
  0x1b   :  { %3422 = shalt.err (!%p3419_p10)
}
  0x1c   :  { %s3423_s20 = scalar_lea.vmem %s23_s12, 2048  ;;  %p3428_p12 = scmp.lt.s32.totalorder %s23_s12, %s23_s12 }
  0x1d   :  { %p3424_p11 = scmp.ne.s32.totalorder %s23_s12, %s3423_s20  ;;  %p3429_p13 = scmp.lt.s32.totalorder %s3423_s20, %s3423_s20 }
  0x1f   :  { %p3430_p0 = por %p3429_p13, %p3428_p12 }
  0x21   :  { %p3431_p1 = pnand %p3430_p0, %p3424_p11 }
  0x23   :  { %3434 = shalt.err (!%p3431_p1)
}
  0x24   :  { %s3559_s1 = smov 128   ;;  %s3560_s21 = smov 8  }
  0x25   :  { %28 = dma.hbm_to_vmem [thread:$0]  %s4710_s0, 2048, %s23_s12, [#allocation4], %s3559_s1, %s3559_s1, %s3560_s21  }
  0x26   :  { %s3561_s24 = smov [#allocation8]   ;;  %s3562_s26 = smov [#allocation9]  }
  0x27   :  { %s46_s25 = sshll.u32 %s3561_s24, 4  ;;  %s58_s27 = sshll.u32 %s3562_s26, 4  ;;  %s47_s25 = int_to_ptr.vmem [resolvable:$true] %s46_s25  ;;  %s3630_s27 = int_to_ptr.vmem [resolvable:$true] %s58_s27 }
  0x28   :  { %s3435_s30 = scalar_lea.hbm %s4712_s2, 2048 }
  0x29   :  { %p3436_p2 = scmp.ne.s32.totalorder %s4712_s2, %s3435_s30  ;;  %p3439_p3 = scmp.lt.u32.totalorder %s3435_s30, %s4712_s2 }
  0x2b   :  { %p3441_p4 = pnand %p3439_p3, %p3436_p2 }
  0x2d   :  { %3444 = shalt.err (!%p3441_p4)
}
  0x2e   :  { %s3445_s0 = scalar_lea.vmem %s47_s25, 2048  ;;  %p3450_p6 = scmp.lt.s32.totalorder %s47_s25, %s47_s25 }
  0x2f   :  { %p3446_p5 = scmp.ne.s32.totalorder %s47_s25, %s3445_s0  ;;  %p3451_p7 = scmp.lt.s32.totalorder %s3445_s0, %s3445_s0 }
  0x31   :  { %p3452_p8 = por %p3451_p7, %p3450_p6 }
  0x33   :  { %p3453_p9 = pnand %p3452_p8, %p3446_p5 }
  0x35   :  { %3456 = shalt.err (!%p3453_p9)
}
  0x36   :  { %52 = dma.hbm_to_vmem [thread:$0]  %s4712_s2, 2048, %s47_s25, [#allocation7], %s3559_s1, %s3559_s1, %s3560_s21  }
  0x37   :  { %s3457_s15 = scalar_lea.hbm %s4713_s3, 2048 }
  0x38   :  { %p3458_p10 = scmp.ne.s32.totalorder %s4713_s3, %s3457_s15  ;;  %p3461_p11 = scmp.lt.u32.totalorder %s3457_s15, %s4713_s3 }
  0x3a   :  { %p3463_p12 = pnand %p3461_p11, %p3458_p10 }
  0x3c   :  { %3466 = shalt.err (!%p3463_p12)
}
  0x3d   :  { %s3467_s20 = scalar_lea.vmem %s3630_s27, 2048  ;;  %p3472_p0 = scmp.lt.s32.totalorder %s3630_s27, %s3630_s27 }
  0x3e   :  { %p3468_p13 = scmp.ne.s32.totalorder %s3630_s27, %s3467_s20  ;;  %p3473_p1 = scmp.lt.s32.totalorder %s3467_s20, %s3467_s20 }
  0x40   :  { %p3474_p2 = por %p3473_p1, %p3472_p0 }
  0x42   :  { %p3475_p3 = pnand %p3474_p2, %p3468_p13 }
  0x44   :  { %3478 = shalt.err (!%p3475_p3)
}
  0x45   :  { %64 = dma.hbm_to_vmem [thread:$0]  %s4713_s3, 2048, %s3630_s27, [#allocation10], %s3559_s1, %s3559_s1, %s3560_s21  }
  0x46   :  { %3545 = dma.done.wait [#allocation4], 2048  }
  0x47   :  { %3546 = vsyncadd [#allocation4], 4294965248 }
  0x48   :  { %3547 = dma.done.wait [#allocation7], 14336  }
  0x49   :  { %3548 = vsyncadd [#allocation7], 4294952960 }
  0x4a   :  { %3549 = dma.done.wait [#allocation10], 2048  }
  0x4b   :  { %3550 = vsyncadd [#allocation10], 4294965248  ;;  %v3071_v0 = vld [vmem:[#allocation6 + $0x4] ss:$24 sps:$4 sm:$0xff]   ;;  %v3075_v2 = vld [vmem:[#allocation6] ss:$24 sps:$4 sm:$0xff]  }
  0x4c   :  { %v3073_v1 = vld [vmem:[#allocation6 + $0xc] ss:$24 sps:$4 sm:$0xff]   ;;  %749 = vmatprep.subr.bf16.mxu0 %v3071_v0  ;;  %v3076_v3 = vld [vmem:[#allocation6 + $0x8] ss:$24 sps:$4 sm:$0xff]   ;;  %v3079_v5 = vld [vmem:[#allocation6 + $0x3c] ss:$24 sps:$4 sm:$0xff]  }
  0x4d   :  { %862 = vmatprep.subr.bf16.mxu1 %v3073_v1  ;;  %v3077_v4 = vld [vmem:[#allocation6 + $0x34] ss:$24 sps:$4 sm:$0xff]   ;;  %750 = vmatpush1.bf16.msra.mxu0 %v3075_v2  ;;  %v3081_v6 = vld [vmem:[#allocation6 + $0x30] ss:$24 sps:$4 sm:$0xff]   ;;  %v3083_v8 = vld [vmem:[#allocation6 + $0x64] ss:$24 sps:$4 sm:$0xff]  }
  0x4e   :  { %863 = vmatpush1.bf16.msra.mxu1 %v3076_v3  ;;  %751 = vmatprep.subr.bf16.mxu0 %v3077_v4  ;;  %v3082_v7 = vld [vmem:[#allocation6 + $0x38] ss:$24 sps:$4 sm:$0xff]   ;;  %v3085_v9 = vld [vmem:[#allocation6 + $0x6c] ss:$24 sps:$4 sm:$0xff]   ;;  %v3088_v11 = vld [vmem:[#allocation6 + $0x68] ss:$24 sps:$4 sm:$0xff]  }
  0x4f   :  { %864 = vmatprep.subr.bf16.mxu1 %v3079_v5  ;;  %v3087_v10 = vld [vmem:[#allocation6 + $0x60] ss:$24 sps:$4 sm:$0xff]   ;;  %v3089_v12 = vld [vmem:[#allocation6 + $0x94] ss:$24 sps:$4 sm:$0xff]   ;;  %v3093_v14 = vld [vmem:[#allocation6 + $0x90] ss:$24 sps:$4 sm:$0xff]  }
  0x50   :  { %v3091_v13 = vld [vmem:[#allocation6 + $0x9c] ss:$24 sps:$4 sm:$0xff]   ;;  %v3094_v15 = vld [vmem:[#allocation6 + $0x98] ss:$24 sps:$4 sm:$0xff]   ;;  %v3097_v17 = vld [vmem:[#allocation6 + $0xcc] ss:$24 sps:$4 sm:$0xff]  }
  0x51   :  { %752 = vmatpush1.bf16.msra.mxu0 %v3081_v6  ;;  %v3095_v16 = vld [vmem:[#allocation6 + $0xc4] ss:$24 sps:$4 sm:$0xff]   ;;  %v3099_v18 = vld [vmem:[#allocation6 + $0xc0] ss:$24 sps:$4 sm:$0xff]   ;;  %v3101_v20 = vld [vmem:[#allocation6 + $0xf4] ss:$24 sps:$4 sm:$0xff]  }
  0x52   :  { %865 = vmatpush1.bf16.msra.mxu1 %v3082_v7  ;;  %753 = vmatprep.subr.bf16.mxu0 %v3083_v8  ;;  %v3100_v19 = vld [vmem:[#allocation6 + $0xc8] ss:$24 sps:$4 sm:$0xff]   ;;  %v3103_v21 = vld [vmem:[#allocation6 + $0xfc] ss:$24 sps:$4 sm:$0xff]   ;;  %v3106_v23 = vld [vmem:[#allocation6 + $0xf8] ss:$24 sps:$4 sm:$0xff]  }
  0x53   :  { %866 = vmatprep.subr.bf16.mxu1 %v3085_v9  ;;  %v3105_v22 = vld [vmem:[#allocation6 + $0xf0] ss:$24 sps:$4 sm:$0xff]   ;;  %v3107_v24 = vld [vmem:[#allocation6 + $0x124] ss:$24 sps:$4 sm:$0xff]   ;;  %v3111_v26 = vld [vmem:[#allocation6 + $0x120] ss:$24 sps:$4 sm:$0xff]  }
  0x54   :  { %v3109_v25 = vld [vmem:[#allocation6 + $0x12c] ss:$24 sps:$4 sm:$0xff]   ;;  %v3112_v27 = vld [vmem:[#allocation6 + $0x128] ss:$24 sps:$4 sm:$0xff]   ;;  %v3115_v29 = vld [vmem:[#allocation6 + $0x15c] ss:$24 sps:$4 sm:$0xff]  }
  0x55   :  { %754 = vmatpush1.bf16.msra.mxu0 %v3087_v10  ;;  %v3113_v28 = vld [vmem:[#allocation6 + $0x154] ss:$24 sps:$4 sm:$0xff]   ;;  %v3117_v30 = vld [vmem:[#allocation6 + $0x150] ss:$24 sps:$4 sm:$0xff]   ;;  %v3119_v32 = vld [vmem:[#allocation6 + $0x184] ss:$24 sps:$4 sm:$0xff]  }
  0x56   :  { %867 = vmatpush1.bf16.msra.mxu1 %v3088_v11  ;;  %755 = vmatprep.subr.bf16.mxu0 %v3089_v12  ;;  %v3118_v31 = vld [vmem:[#allocation6 + $0x158] ss:$24 sps:$4 sm:$0xff]   ;;  %v3121_v33 = vld [vmem:[#allocation6 + $0x18c] ss:$24 sps:$4 sm:$0xff]   ;;  %v3124_v35 = vld [vmem:[#allocation6 + $0x188] ss:$24 sps:$4 sm:$0xff]  }
  0x57   :  { %868 = vmatprep.subr.bf16.mxu1 %v3091_v13  ;;  %v3123_v34 = vld [vmem:[#allocation6 + $0x180] ss:$24 sps:$4 sm:$0xff]   ;;  %v3125_v36 = vld [vmem:[#allocation6 + $0x1b4] ss:$24 sps:$4 sm:$0xff]   ;;  %v3129_v38 = vld [vmem:[#allocation6 + $0x1b0] ss:$24 sps:$4 sm:$0xff]  }
  0x58   :  { %v3127_v37 = vld [vmem:[#allocation6 + $0x1bc] ss:$24 sps:$4 sm:$0xff]   ;;  %v3130_v39 = vld [vmem:[#allocation6 + $0x1b8] ss:$24 sps:$4 sm:$0xff]   ;;  %v3133_v41 = vld [vmem:[#allocation6 + $0x1ec] ss:$24 sps:$4 sm:$0xff]  }
  0x59   :  { %756 = vmatpush1.bf16.msra.mxu0 %v3093_v14  ;;  %v3131_v40 = vld [vmem:[#allocation6 + $0x1e4] ss:$24 sps:$4 sm:$0xff]   ;;  %v3135_v42 = vld [vmem:[#allocation6 + $0x1e0] ss:$24 sps:$4 sm:$0xff]   ;;  %v3137_v44 = vld [vmem:[#allocation6 + $0x214] ss:$24 sps:$4 sm:$0xff]  }
  0x5a   :  { %869 = vmatpush1.bf16.msra.mxu1 %v3094_v15  ;;  %757 = vmatprep.subr.bf16.mxu0 %v3095_v16  ;;  %v3136_v43 = vld [vmem:[#allocation6 + $0x1e8] ss:$24 sps:$4 sm:$0xff]   ;;  %v3139_v45 = vld [vmem:[#allocation6 + $0x21c] ss:$24 sps:$4 sm:$0xff]   ;;  %v3142_v47 = vld [vmem:[#allocation6 + $0x218] ss:$24 sps:$4 sm:$0xff]  }
  0x5b   :  { %870 = vmatprep.subr.bf16.mxu1 %v3097_v17  ;;  %v3141_v46 = vld [vmem:[#allocation6 + $0x210] ss:$24 sps:$4 sm:$0xff]   ;;  %v3667_v48 = vld [vmem:[#allocation3 + $0x4] ss:$8 sps:$4 sm:$0xff]   ;;  %v3147_v51 = vld [vmem:[#allocation6 + $0x240] ss:$24 sps:$4 sm:$0xff]  }
  0x5c   :  { %v3143_v49 = vld [vmem:[#allocation6 + $0x244] ss:$24 sps:$4 sm:$0xff]   ;;  %781 = vmatprep.mubr.bf16.mxu0 %v3667_v48  ;;  %894 = vmatprep.mubr.bf16.mxu1 %v3667_v48  ;;  %v3148_v52 = vld [vmem:[#allocation6 + $0x248] ss:$24 sps:$4 sm:$0xff]   ;;  %v3149_v53 = vld [vmem:[#allocation6 + $0x274] ss:$24 sps:$4 sm:$0xff]  }
  0x5d   :  { %758 = vmatpush1.bf16.msra.mxu0 %v3099_v18  ;;  %v3145_v50 = vld [vmem:[#allocation6 + $0x24c] ss:$24 sps:$4 sm:$0xff]   ;;  %v3151_v54 = vld [vmem:[#allocation6 + $0x27c] ss:$24 sps:$4 sm:$0xff]   ;;  %v3153_v55 = vld [vmem:[#allocation6 + $0x270] ss:$24 sps:$4 sm:$0xff]  }
  0x5e   :  { %871 = vmatpush1.bf16.msra.mxu1 %v3100_v19  ;;  %759 = vmatprep.subr.bf16.mxu0 %v3101_v20  ;;  %v3154_v56 = vld [vmem:[#allocation6 + $0x278] ss:$24 sps:$4 sm:$0xff]   ;;  %v3155_v57 = vld [vmem:[#allocation6 + $0x2a4] ss:$24 sps:$4 sm:$0xff]   ;;  %v3160_v60 = vld [vmem:[#allocation6 + $0x2a8] ss:$24 sps:$4 sm:$0xff]  }
  0x5f   :  { %872 = vmatprep.subr.bf16.mxu1 %v3103_v21  ;;  %v3157_v58 = vld [vmem:[#allocation6 + $0x2ac] ss:$24 sps:$4 sm:$0xff]   ;;  %v3159_v59 = vld [vmem:[#allocation6 + $0x2a0] ss:$24 sps:$4 sm:$0xff]   ;;  %v3163_v62 = vld [vmem:[#allocation6 + $0x2dc] ss:$24 sps:$4 sm:$0xff]  }
  0x60   :  { %v3161_v61 = vld [vmem:[#allocation6 + $0x2d4] ss:$24 sps:$4 sm:$0xff]   ;;  %v3165_v63 = vld [vmem:[#allocation6 + $0x2d0] ss:$24 sps:$4 sm:$0xff]   ;;  %s3563_s3 = smov 64   ;;  %s3564_s23 = smov [#allocation12]  }
  0x61   :  { %760 = vmatpush1.bf16.msra.mxu0 %v3105_v22  ;;  %v3166_v0 = vld [vmem:[#allocation6 + $0x2d8] ss:$24 sps:$4 sm:$0xff]   ;;  %v3169_v1 = vld [vmem:[#allocation3] ss:$8 sps:$4 sm:$0xff]   ;;  %v3170_v2 = vld [vmem:[#allocation3 + $0x14] ss:$8 sps:$4 sm:$0xff]  }
  0x62   :  { %873 = vmatpush1.bf16.msra.mxu1 %v3106_v23  ;;  %761 = vmatprep.subr.bf16.mxu0 %v3107_v24  ;;  %v3172_v3 = vld [vmem:[#allocation3 + $0x10] ss:$8 sps:$4 sm:$0xff]   ;;  %v3173_v4 = vld [vmem:[#allocation3 + $0x24] ss:$8 sps:$4 sm:$0xff]   ;;  %v3175_v5 = vld [vmem:[#allocation3 + $0x20] ss:$8 sps:$4 sm:$0xff]  }
  0x63   :  { %874 = vmatprep.subr.bf16.mxu1 %v3109_v25  ;;  %v3176_v6 = vld [vmem:[#allocation3 + $0x34] ss:$8 sps:$4 sm:$0xff]   ;;  %v3178_v7 = vld [vmem:[#allocation3 + $0x30] ss:$8 sps:$4 sm:$0xff]   ;;  %v3179_v8 = vld [vmem:[#allocation3 + $0x44] ss:$8 sps:$4 sm:$0xff]  }
  0x64   :  { %v3181_v9 = vld [vmem:[#allocation3 + $0x40] ss:$8 sps:$4 sm:$0xff]   ;;  %v3182_v10 = vld [vmem:[#allocation3 + $0x54] ss:$8 sps:$4 sm:$0xff]   ;;  %v3184_v11 = vld [vmem:[#allocation3 + $0x50] ss:$8 sps:$4 sm:$0xff]  }
  0x65   :  { %762 = vmatpush1.bf16.msra.mxu0 %v3111_v26  ;;  %v3185_v12 = vld [vmem:[#allocation3 + $0x64] ss:$8 sps:$4 sm:$0xff]   ;;  %v3187_v13 = vld [vmem:[#allocation3 + $0x60] ss:$8 sps:$4 sm:$0xff]   ;;  %v3188_v14 = vld [vmem:[#allocation3 + $0x74] ss:$8 sps:$4 sm:$0xff]  }
  0x66   :  { %875 = vmatpush1.bf16.msra.mxu1 %v3112_v27  ;;  %763 = vmatprep.subr.bf16.mxu0 %v3113_v28  ;;  %v3190_v15 = vld [vmem:[#allocation3 + $0x70] ss:$8 sps:$4 sm:$0xff]   ;;  %s2626_s24 = sshll.u32 %s3564_s23, 4  ;;  %s3565_s25 = smov [#allocation14]   ;;  %s2627_s24 = int_to_ptr.vmem [resolvable:$true] %s2626_s24 }
  0x67   :  { %876 = vmatprep.subr.bf16.mxu1 %v3115_v29  ;;  %s2638_s26 = sshll.u32 %s3565_s25, 4  ;;  %s3479_s27 = scalar_lea.vmem %s2627_s24, 2048  ;;  %s4621_s26 = int_to_ptr.vmem [resolvable:$true] %s2638_s26 }
  0x68   :  { %p3480_p4 = scmp.ne.s32.totalorder %s2627_s24, %s3479_s27  ;;  %p3484_p5 = scmp.lt.s32.totalorder %s2627_s24, %s2627_s24 }
  0x69   :  { %764 = vmatpush1.bf16.msra.mxu0 %v3117_v30  ;;  %p3485_p6 = scmp.lt.s32.totalorder %s3479_s27, %s3479_s27 }
  0x6a   :  { %877 = vmatpush1.bf16.msra.mxu1 %v3118_v31  ;;  %765 = vmatprep.subr.bf16.mxu0 %v3119_v32 }
  0x6b   :  { %878 = vmatprep.subr.bf16.mxu1 %v3121_v33  ;;  %p3486_p7 = por %p3485_p6, %p3484_p5 }
  0x6d   :  { %766 = vmatpush1.bf16.msra.mxu0 %v3123_v34  ;;  %p3487_p8 = pnand %p3486_p7, %p3480_p4 }
  0x6e   :  { %879 = vmatpush1.bf16.msra.mxu1 %v3124_v35  ;;  %767 = vmatprep.subr.bf16.mxu0 %v3125_v36 }
  0x6f   :  { %880 = vmatprep.subr.bf16.mxu1 %v3127_v37 }
  0x71   :  { %768 = vmatpush1.bf16.msra.mxu0 %v3129_v38 }
  0x72   :  { %881 = vmatpush1.bf16.msra.mxu1 %v3130_v39  ;;  %769 = vmatprep.subr.bf16.mxu0 %v3131_v40 }
  0x73   :  { %882 = vmatprep.subr.bf16.mxu1 %v3133_v41 }
  0x75   :  { %770 = vmatpush1.bf16.msra.mxu0 %v3135_v42 }
  0x76   :  { %883 = vmatpush1.bf16.msra.mxu1 %v3136_v43  ;;  %771 = vmatprep.subr.bf16.mxu0 %v3137_v44 }
  0x77   :  { %884 = vmatprep.subr.bf16.mxu1 %v3139_v45 }
  0x79   :  { %772 = vmatpush1.bf16.msra.mxu0 %v3141_v46 }
  0x7a   :  { %885 = vmatpush1.bf16.msra.mxu1 %v3142_v47  ;;  %773 = vmatprep.subr.bf16.mxu0 %v3143_v49 }
  0x7b   :  { %886 = vmatprep.subr.bf16.mxu1 %v3145_v50 }
  0x7d   :  { %774 = vmatpush1.bf16.msra.mxu0 %v3147_v51 }
  0x7e   :  { %887 = vmatpush1.bf16.msra.mxu1 %v3148_v52  ;;  %775 = vmatprep.subr.bf16.mxu0 %v3149_v53 }
  0x7f   :  { %888 = vmatprep.subr.bf16.mxu1 %v3151_v54 }
  0x81   :  { %776 = vmatpush1.bf16.msra.mxu0 %v3153_v55 }
  0x82   :  { %889 = vmatpush1.bf16.msra.mxu1 %v3154_v56  ;;  %777 = vmatprep.subr.bf16.mxu0 %v3155_v57 }
  0x83   :  { %890 = vmatprep.subr.bf16.mxu1 %v3157_v58 }
  0x85   :  { %778 = vmatpush1.bf16.msra.mxu0 %v3159_v59 }
  0x86   :  { %891 = vmatpush1.bf16.msra.mxu1 %v3160_v60  ;;  %779 = vmatprep.subr.bf16.mxu0 %v3161_v61 }
  0x87   :  { %892 = vmatprep.subr.bf16.mxu1 %v3163_v62 }
  0x89   :  { %780 = vmatpush1.bf16.msra.mxu0 %v3165_v63 }
  0x8a   :  { %893 = vmatpush1.bf16.msra.mxu1 %v3166_v0 }
  0x8c   :  { %782 = vmatmul.mubr.bf16.vlgmr.msra.gmra.mrb[0].mxu0 %v3169_v1 }
  0x8d   :  { %895 = vmatmul.mubr.bf16.vlgmr.msra.gmra.mrb[0].mxu1 %v3169_v1  ;;  %791 = vmatprep.mubr.bf16.mxu0 %v3170_v2 }
  0x8e   :  { %904 = vmatprep.mubr.bf16.mxu1 %v3170_v2 }
  0x94   :  { %792 = vmatmul.mubr.bf16.gmra.mrb[4].mxu0 %v3172_v3 }
  0x95   :  { %905 = vmatmul.mubr.bf16.gmra.mrb[4].mxu1 %v3172_v3  ;;  %801 = vmatprep.mubr.bf16.mxu0 %v3173_v4 }
  0x96   :  { %914 = vmatprep.mubr.bf16.mxu1 %v3173_v4 }
  0x9c   :  { %802 = vmatmul.mubr.bf16.gmra.mrb[8].mxu0 %v3175_v5 }
  0x9d   :  { %915 = vmatmul.mubr.bf16.gmra.mrb[8].mxu1 %v3175_v5  ;;  %811 = vmatprep.mubr.bf16.mxu0 %v3176_v6 }
  0x9e   :  { %924 = vmatprep.mubr.bf16.mxu1 %v3176_v6 }
  0xa4   :  { %812 = vmatmul.mubr.bf16.gmra.mrb[12].mxu0 %v3178_v7 }
  0xa5   :  { %925 = vmatmul.mubr.bf16.gmra.mrb[12].mxu1 %v3178_v7  ;;  %821 = vmatprep.mubr.bf16.mxu0 %v3179_v8 }
  0xa6   :  { %934 = vmatprep.mubr.bf16.mxu1 %v3179_v8 }
  0xac   :  { %822 = vmatmul.mubr.bf16.gmra.mrb[16].mxu0 %v3181_v9 }
  0xad   :  { %935 = vmatmul.mubr.bf16.gmra.mrb[16].mxu1 %v3181_v9  ;;  %831 = vmatprep.mubr.bf16.mxu0 %v3182_v10 }
  0xae   :  { %944 = vmatprep.mubr.bf16.mxu1 %v3182_v10 }
  0xb4   :  { %832 = vmatmul.mubr.bf16.gmra.mrb[20].mxu0 %v3184_v11 }
  0xb5   :  { %945 = vmatmul.mubr.bf16.gmra.mrb[20].mxu1 %v3184_v11  ;;  %841 = vmatprep.mubr.bf16.mxu0 %v3185_v12 }
  0xb6   :  { %954 = vmatprep.mubr.bf16.mxu1 %v3185_v12 }
  0xbc   :  { %842 = vmatmul.mubr.bf16.gmra.mrb[24].mxu0 %v3187_v13 }
  0xbd   :  { %955 = vmatmul.mubr.bf16.gmra.mrb[24].mxu1 %v3187_v13  ;;  %851 = vmatprep.mubr.bf16.mxu0 %v3188_v14 }
  0xbe   :  { %964 = vmatprep.mubr.bf16.mxu1 %v3188_v14 }
  0xc4   :  { %852 = vmatmul.mubr.bf16.gmra.mrb[28].mxu0 %v3190_v15 }
  0xc5   :  { %965 = vmatmul.mubr.bf16.gmra.mrb[28].mxu1 %v3190_v15  ;;  %1007 = vmatprep.mubr.bf16.mxu0 %v3667_v48 }
  0xc6   :  { %1047 = vmatprep.mubr.bf16.mxu1 %v3179_v8 }
 0x15f   :  { %v783_v16 = vpop.f32.mrb[0].mxu0 }
 0x160   :  { %v896_v17 = vpop.f32.mrb[0].mxu1  ;;  %v785_v18 = vpop.f32.mrb[1].mxu0 }
 0x161   :  { %v898_v19 = vpop.f32.mrb[1].mxu1  ;;  %v787_v20 = vpop.f32.mrb[2].mxu0 }
 0x162   :  { %v900_v21 = vpop.f32.mrb[2].mxu1  ;;  %v1088_v22 = vpack.c.bf16 %v787_v20, %v783_v16  ;;  %v789_v25 = vpop.f32.mrb[3].mxu0 }
 0x163   :  { %v1090_v23 = vpack.c.bf16 %v900_v21, %v896_v17  ;;  %v902_v24 = vpop.f32.mrb[3].mxu1  ;;  %v1089_v27 = vpack.c.bf16 %v789_v25, %v785_v18 }
 0x164   :  { %v1091_v26 = vpack.c.bf16 %v902_v24, %v898_v19  ;;  %v3672_v28 = vunpack.c.h.bf16 %v1088_v22  ;;  %v3676_v30 = vunpack.c.l.bf16 %v1088_v22 }
 0x165   :  { %v3674_v29 = vunpack.c.h.bf16 %v1090_v23  ;;  %v3686_v39 = vunpack.c.l.bf16 %v1090_v23  ;;  %v3688_v42 = vunpack.c.l.bf16 %v1089_v27  ;;  %v3696_v51 = vunpack.c.h.bf16 %v1089_v27 }
 0x166   :  { %v3678_v31 = vunpack.c.l.bf16 %v1091_v26  ;;  %v1376_v33 = vmul.f32 %v3676_v30, %v3676_v30  ;;  %v1377_v36 = vmul.f32 %v3672_v28, %v3672_v28  ;;  %v3694_v50 = vunpack.c.h.bf16 %v1091_v26 }
 0x167   :  { %v1490_v32 = vmul.f32 %v3674_v29, %v3674_v29  ;;  %v793_v34 = vpop.f32.mrb[4].mxu0  ;;  %4744 = vst [vmem:[#allocation20_spill] sm:$0xff] %v3688_v42  ;;  %4745 = vst [vmem:[#allocation21_spill] sm:$0xff] %v3696_v51  ;;  %v1489_v52 = vmul.f32 %v3686_v39, %v3686_v39  ;;  %v2017_v53 = vmul.f32 %v3688_v42, %v3688_v42 }
 0x168   :  { %v906_v35 = vpop.f32.mrb[4].mxu1  ;;  %1392 = vadd.xlane.f32.xlu0 %v1376_v33  ;;  %v795_v37 = vpop.f32.mrb[5].mxu0  ;;  %v2129_v43 = vmul.f32 %v3678_v31, %v3678_v31  ;;  %v2130_v59 = vmul.f32 %v3694_v50, %v3694_v50  ;;  %v2018_v63 = vmul.f32 %v3696_v51, %v3696_v51 }
 0x169   :  { %1507 = vadd.xlane.f32.xlu1 %v1490_v32  ;;  %v908_v38 = vpop.f32.mrb[5].mxu1  ;;  %v797_v40 = vpop.f32.mrb[6].mxu0 }
 0x16a   :  { %v910_v41 = vpop.f32.mrb[6].mxu1  ;;  %v1094_v44 = vpack.c.bf16 %v797_v40, %v793_v34  ;;  %v799_v45 = vpop.f32.mrb[7].mxu0 }
 0x16b   :  { %v1096_v46 = vpack.c.bf16 %v910_v41, %v906_v35  ;;  %v912_v47 = vpop.f32.mrb[7].mxu1  ;;  %v3692_v48 = vpack.c.bf16 %v799_v45, %v795_v37 }
 0x16c   :  { %v1097_v49 = vpack.c.bf16 %v912_v47, %v908_v38  ;;  %1394 = vadd.xlane.f32.xlu0 %v1377_v36  ;;  %v3706_v62 = vunpack.c.l.bf16 %v1094_v44  ;;  %v3720_v8 = vunpack.c.h.bf16 %v1094_v44 }
 0x16d   :  { %2145 = vadd.xlane.f32.xlu1 %v2129_v43  ;;  %v3702_v56 = vunpack.c.l.bf16 %v1096_v46  ;;  %v3726_v15 = vunpack.c.h.bf16 %v1096_v46  ;;  %v3743_v27 = vunpack.c.l.bf16 %v3692_v48  ;;  %v3755_v44 = vunpack.c.h.bf16 %v3692_v48 }
 0x16e   :  { %v3716_v6 = vunpack.c.l.bf16 %v1097_v49  ;;  %v1378_v9 = vmul.f32 %v3706_v62, %v3706_v62  ;;  %v3728_v18 = vunpack.c.h.bf16 %v1097_v49  ;;  %v1379_v19 = vmul.f32 %v3720_v8, %v3720_v8 }
 0x16f   :  { %v803_v54 = vpop.f32.mrb[8].mxu0  ;;  %v1491_v7 = vmul.f32 %v3702_v56, %v3702_v56  ;;  %4746 = vst [vmem:[#allocation22_spill] sm:$0xff] %v3743_v27  ;;  %v1492_v33 = vmul.f32 %v3726_v15, %v3726_v15  ;;  %4747 = vst [vmem:[#allocation23_spill] sm:$0xff] %v3755_v44  ;;  %v2019_v45 = vmul.f32 %v3743_v27, %v3743_v27 }
 0x170   :  { %v916_v55 = vpop.f32.mrb[8].mxu1  ;;  %1505 = vadd.xlane.f32.xlu0 %v1489_v52  ;;  %v805_v57 = vpop.f32.mrb[9].mxu0  ;;  %v2131_v12 = vmul.f32 %v3716_v6, %v3716_v6  ;;  %v2132_v32 = vmul.f32 %v3728_v18, %v3728_v18 }
 0x171   :  { %2033 = vadd.xlane.f32.xlu1 %v2017_v53  ;;  %v918_v58 = vpop.f32.mrb[9].mxu1  ;;  %v807_v60 = vpop.f32.mrb[10].mxu0 }
 0x172   :  { %v920_v61 = vpop.f32.mrb[10].mxu1  ;;  %v1100_v0 = vpack.c.bf16 %v807_v60, %v803_v54  ;;  %v809_v2 = vpop.f32.mrb[11].mxu0 }
 0x173   :  { %v3710_v1 = vpack.c.bf16 %v920_v61, %v916_v55  ;;  %v922_v3 = vpop.f32.mrb[11].mxu1  ;;  %v3712_v4 = vpack.c.bf16 %v809_v2, %v805_v57 }
 0x174   :  { %v3714_v5 = vpack.c.bf16 %v922_v3, %v918_v58  ;;  %2147 = vadd.xlane.f32.xlu0 %v2130_v59  ;;  %v3740_v26 = vunpack.c.l.bf16 %v1100_v0  ;;  %v3772_v57 = vunpack.c.h.bf16 %v1100_v0  ;;  %v2020_v58 = vmul.f32 %v3755_v44, %v3755_v44 }
 0x175   :  { %2035 = vadd.xlane.f32.xlu1 %v2018_v63  ;;  %v3750_v36 = vunpack.c.l.bf16 %v3710_v1  ;;  %v3782_v0 = vunpack.c.h.bf16 %v3710_v1 }
 0x176   :  { %v1380_v37 = vmul.f32 %v3740_v26, %v3740_v26  ;;  %v3768_v55 = vunpack.c.h.bf16 %v3714_v5 }
 0x177   :  { %v813_v10 = vpop.f32.mrb[12].mxu0  ;;  %v1493_v48 = vmul.f32 %v3750_v36, %v3750_v36 }
 0x178   :  { %v926_v11 = vpop.f32.mrb[12].mxu1  ;;  %1509 = vadd.xlane.f32.xlu0 %v1491_v7  ;;  %v815_v13 = vpop.f32.mrb[13].mxu0  ;;  %v2134_v63 = vmul.f32 %v3768_v55, %v3768_v55 }
 0x179   :  { %1396 = vadd.xlane.f32.xlu1 %v1378_v9  ;;  %v928_v14 = vpop.f32.mrb[13].mxu1  ;;  %v817_v16 = vpop.f32.mrb[14].mxu0 }
 0x17a   :  { %v930_v17 = vpop.f32.mrb[14].mxu1  ;;  %v3732_v20 = vpack.c.bf16 %v817_v16, %v813_v10  ;;  %v819_v23 = vpop.f32.mrb[15].mxu0  ;;  %v1381_v10 = vmul.f32 %v3772_v57, %v3772_v57 }
 0x17b   :  { %v3734_v21 = vpack.c.bf16 %v930_v17, %v926_v11  ;;  %v932_v22 = vpop.f32.mrb[15].mxu1  ;;  %v3738_v25 = vpack.c.bf16 %v819_v23, %v815_v13  ;;  %v1494_v23 = vmul.f32 %v3782_v0, %v3782_v0 }
 0x17c   :  { %v3736_v24 = vpack.c.bf16 %v932_v22, %v928_v14  ;;  %2149 = vadd.xlane.f32.xlu0 %v2131_v12  ;;  %v3777_v61 = vunpack.c.l.bf16 %v3732_v20  ;;  %v3800_v22 = vunpack.c.l.bf16 %v3714_v5  ;;  %v3810_v5 = vunpack.c.l.bf16 %v3712_v4 }
 0x17d   :  { %1398 = vadd.xlane.f32.xlu1 %v1379_v19  ;;  %v3795_v19 = vunpack.c.l.bf16 %v3734_v21 }
 0x17e   :  { %v1382_v1 = vmul.f32 %v3777_v61, %v3777_v61  ;;  %4748 = vst [vmem:[#allocation24_spill] sm:$0xff] %v3810_v5 }
 0x17f   :  { %v823_v34 = vpop.f32.mrb[16].mxu0 }
 0x180   :  { %v936_v35 = vpop.f32.mrb[16].mxu1  ;;  %2151 = vadd.xlane.f32.xlu0 %v2132_v32  ;;  %v825_v38 = vpop.f32.mrb[17].mxu0 }
 0x181   :  { %1511 = vadd.xlane.f32.xlu1 %v1492_v33  ;;  %v938_v40 = vpop.f32.mrb[17].mxu1  ;;  %v827_v41 = vpop.f32.mrb[18].mxu0 }
 0x182   :  { %v940_v43 = vpop.f32.mrb[18].mxu1  ;;  %v3759_v46 = vpack.c.bf16 %v827_v41, %v823_v34  ;;  %v829_v52 = vpop.f32.mrb[19].mxu0  ;;  %v3805_v34 = vunpack.c.h.bf16 %v3736_v24 }
 0x183   :  { %v3761_v47 = vpack.c.bf16 %v940_v43, %v936_v35  ;;  %v942_v49 = vpop.f32.mrb[19].mxu1  ;;  %v3765_v54 = vpack.c.bf16 %v829_v52, %v825_v38  ;;  %v1495_v35 = vmul.f32 %v3795_v19, %v3795_v19  ;;  %v2133_v43 = vmul.f32 %v3800_v22, %v3800_v22 }
 0x184   :  { %v3763_v53 = vpack.c.bf16 %v942_v49, %v938_v40  ;;  %1400 = vadd.xlane.f32.xlu0 %v1380_v37 }
 0x185   :  { %2037 = vadd.xlane.f32.xlu1 %v2019_v45 }
 0x187   :  { %v833_v59 = vpop.f32.mrb[20].mxu0 }
 0x188   :  { %v946_v60 = vpop.f32.mrb[20].mxu1  ;;  %1513 = vadd.xlane.f32.xlu0 %v1493_v48  ;;  %v835_v2 = vpop.f32.mrb[21].mxu0 }
 0x189   :  { %2039 = vadd.xlane.f32.xlu1 %v2020_v58  ;;  %v948_v3 = vpop.f32.mrb[21].mxu1  ;;  %v837_v7 = vpop.f32.mrb[22].mxu0 }
 0x18a   :  { %v950_v9 = vpop.f32.mrb[22].mxu1  ;;  %v3786_v11 = vpack.c.bf16 %v837_v7, %v833_v59  ;;  %v839_v14 = vpop.f32.mrb[23].mxu0 }
 0x18b   :  { %v3788_v12 = vpack.c.bf16 %v950_v9, %v946_v60  ;;  %v952_v13 = vpop.f32.mrb[23].mxu1  ;;  %v3792_v17 = vpack.c.bf16 %v839_v14, %v835_v2  ;;  %v3823_v60 = vunpack.c.l.bf16 %v3759_v46  ;;  %v3828_v2 = vunpack.c.h.bf16 %v3712_v4 }
 0x18c   :  { %v3790_v16 = vpack.c.bf16 %v952_v13, %v948_v3  ;;  %2155 = vadd.xlane.f32.xlu0 %v2134_v63  ;;  %v2136_v63 = vmul.f32 %v3805_v34, %v3805_v34  ;;  %v2021_v3 = vmul.f32 %v3810_v5, %v3810_v5  ;;  %v3838_v4 = vunpack.c.h.bf16 %v3732_v20 }
 0x18d   :  { %1402 = vadd.xlane.f32.xlu1 %v1381_v10  ;;  %4749 = vst [vmem:[#allocation25_spill] sm:$0xff] %v3828_v2  ;;  %v3833_v10 = vunpack.c.l.bf16 %v3761_v47  ;;  %v1384_v13 = vmul.f32 %v3823_v60, %v3823_v60 }
 0x18f   :  { %v843_v32 = vpop.f32.mrb[24].mxu0  ;;  %v1497_v20 = vmul.f32 %v3833_v10, %v3833_v10 }
 0x190   :  { %v956_v33 = vpop.f32.mrb[24].mxu1  ;;  %1404 = vadd.xlane.f32.xlu0 %v1382_v1  ;;  %v845_v37 = vpop.f32.mrb[25].mxu0 }
 0x191   :  { %1515 = vadd.xlane.f32.xlu1 %v1494_v23  ;;  %v958_v38 = vpop.f32.mrb[25].mxu1  ;;  %v847_v40 = vpop.f32.mrb[26].mxu0 }
 0x192   :  { %v960_v41 = vpop.f32.mrb[26].mxu1  ;;  %v3814_v45 = vpack.c.bf16 %v847_v40, %v843_v32  ;;  %v849_v48 = vpop.f32.mrb[27].mxu0 }
 0x193   :  { %v3816_v49 = vpack.c.bf16 %v960_v41, %v956_v33  ;;  %v962_v52 = vpop.f32.mrb[27].mxu1  ;;  %v3820_v59 = vpack.c.bf16 %v849_v48, %v845_v37  ;;  %v2022_v33 = vmul.f32 %v3828_v2, %v3828_v2  ;;  %v3856_v48 = vunpack.c.h.bf16 %v3734_v21 }
 0x194   :  { %v3818_v58 = vpack.c.bf16 %v962_v52, %v958_v38  ;;  %1517 = vadd.xlane.f32.xlu0 %v1495_v35  ;;  %v3851_v52 = vunpack.c.h.bf16 %v3763_v53  ;;  %v3871_v21 = vunpack.c.l.bf16 %v3788_v12 }
 0x195   :  { %2153 = vadd.xlane.f32.xlu1 %v2133_v43 }
 0x197   :  { %v853_v7 = vpop.f32.mrb[28].mxu0 }
 0x198   :  { %v966_v9 = vpop.f32.mrb[28].mxu1  ;;  %2159 = vadd.xlane.f32.xlu0 %v2136_v63  ;;  %v855_v14 = vpop.f32.mrb[29].mxu0  ;;  %v1383_v63 = vmul.f32 %v3838_v4, %v3838_v4 }
 0x199   :  { %2041 = vadd.xlane.f32.xlu1 %v2021_v3  ;;  %v968_v1 = vpop.f32.mrb[29].mxu1  ;;  %v857_v23 = vpop.f32.mrb[30].mxu0  ;;  %v3861_v3 = vunpack.c.l.bf16 %v3786_v11 }
 0x19a   :  { %v970_v32 = vpop.f32.mrb[30].mxu1  ;;  %v3842_v35 = vpack.c.bf16 %v857_v23, %v853_v7  ;;  %v859_v40 = vpop.f32.mrb[31].mxu0  ;;  %v2138_v7 = vmul.f32 %v3851_v52, %v3851_v52 }
 0x19b   :  { %v3844_v37 = vpack.c.bf16 %v970_v32, %v966_v9  ;;  %v972_v38 = vpop.f32.mrb[31].mxu1  ;;  %v3848_v43 = vpack.c.bf16 %v859_v40, %v855_v14  ;;  %v3866_v9 = vunpack.c.l.bf16 %v3736_v24  ;;  %v1386_v14 = vmul.f32 %v3861_v3, %v3861_v3 }
 0x19c   :  { %v3846_v41 = vpack.c.bf16 %v972_v38, %v968_v1  ;;  %1408 = vadd.xlane.f32.xlu0 %v1384_v13  ;;  %v1496_v13 = vmul.f32 %v3856_v48, %v3856_v48  ;;  %v3876_v1 = vunpack.c.l.bf16 %v3738_v25  ;;  %v3881_v24 = vunpack.c.h.bf16 %v3790_v16 }
 0x19d   :  { %2043 = vadd.xlane.f32.xlu1 %v2022_v33  ;;  %v2135_v23 = vmul.f32 %v3866_v9, %v3866_v9  ;;  %v1499_v32 = vmul.f32 %v3871_v21, %v3871_v21  ;;  %v3886_v33 = vunpack.c.h.bf16 %v3738_v25  ;;  %v3891_v40 = vunpack.c.l.bf16 %v3814_v45 }
 0x19e   :  { %4750 = vst [vmem:[#allocation26_spill] sm:$0xff] %v3876_v1  ;;  %v2023_v38 = vmul.f32 %v3876_v1, %v3876_v1  ;;  %v3901_v25 = vunpack.c.l.bf16 %v3816_v49  ;;  %v3941_v1 = vunpack.c.l.bf16 %v3844_v37 }
 0x19f   :  { %4751 = vst [vmem:[#allocation27_spill] sm:$0xff] %v3886_v33 }
 0x1a0   :  { %1521 = vadd.xlane.f32.xlu0 %v1497_v20  ;;  %v2140_v20 = vmul.f32 %v3881_v24, %v3881_v24 }
 0x1a1   :  { %1406 = vadd.xlane.f32.xlu1 %v1383_v63  ;;  %v3896_v63 = vunpack.c.h.bf16 %v3759_v46  ;;  %v3911_v46 = vunpack.c.h.bf16 %v3818_v58 }
 0x1a4   :  { %2163 = vadd.xlane.f32.xlu0 %v2138_v7  ;;  %v2024_v7 = vmul.f32 %v3886_v33, %v3886_v33 }
 0x1a5   :  { %1519 = vadd.xlane.f32.xlu1 %v1496_v13  ;;  %v1388_v13 = vmul.f32 %v3891_v40, %v3891_v40 }
 0x1a8   :  { %1412 = vadd.xlane.f32.xlu0 %v1386_v14  ;;  %v3906_v14 = vunpack.c.h.bf16 %v3761_v47  ;;  %v3921_v47 = vunpack.c.l.bf16 %v3820_v59 }
 0x1a9   :  { %2157 = vadd.xlane.f32.xlu1 %v2135_v23  ;;  %v1385_v23 = vmul.f32 %v3896_v63, %v3896_v63 }
 0x1aa   :  { %4752 = vst [vmem:[#allocation28_spill] sm:$0xff] %v3921_v47 }
 0x1ac   :  { %1525 = vadd.xlane.f32.xlu0 %v1499_v32  ;;  %v1501_v32 = vmul.f32 %v3901_v25, %v3901_v25 }
 0x1ad   :  { %2045 = vadd.xlane.f32.xlu1 %v2023_v38  ;;  %v3916_v38 = vunpack.c.l.bf16 %v3763_v53  ;;  %v3931_v53 = vunpack.c.l.bf16 %v3842_v35 }
 0x1b0   :  { %2167 = vadd.xlane.f32.xlu0 %v2140_v20  ;;  %v1498_v20 = vmul.f32 %v3906_v14, %v3906_v14 }
 0x1b1   :  { %2047 = vadd.xlane.f32.xlu1 %v2024_v7  ;;  %v2142_v7 = vmul.f32 %v3911_v46, %v3911_v46 }
 0x1b4   :  { %1416 = vadd.xlane.f32.xlu0 %v1388_v13  ;;  %v3926_v13 = vunpack.c.l.bf16 %v3765_v54 }
 0x1b5   :  { %1410 = vadd.xlane.f32.xlu1 %v1385_v23  ;;  %v2137_v23 = vmul.f32 %v3916_v38, %v3916_v38 }
 0x1b6   :  { %4753 = vst [vmem:[#allocation29_spill] sm:$0xff] %v3926_v13  ;;  %v2025_v33 = vmul.f32 %v3926_v13, %v3926_v13 }
 0x1b8   :  { %1529 = vadd.xlane.f32.xlu0 %v1501_v32  ;;  %v2029_v32 = vmul.f32 %v3921_v47, %v3921_v47 }
 0x1b9   :  { %1523 = vadd.xlane.f32.xlu1 %v1498_v20  ;;  %v3936_v20 = vunpack.c.h.bf16 %v3765_v54  ;;  %v3951_v54 = vunpack.c.h.bf16 %v3846_v41 }
 0x1bb   :  { %4754 = vst [vmem:[#allocation30_spill] sm:$0xff] %v3936_v20  ;;  %v2026_v47 = vmul.f32 %v3936_v20, %v3936_v20  ;;  %v3968_v20 = vunpack.c.l.bf16 %v3792_v17 }
 0x1bc   :  { %2171 = vadd.xlane.f32.xlu0 %v2142_v7  ;;  %v1390_v7 = vmul.f32 %v3931_v53, %v3931_v53 }
 0x1bd   :  { %2161 = vadd.xlane.f32.xlu1 %v2137_v23  ;;  %v3946_v23 = vunpack.c.h.bf16 %v3786_v11  ;;  %v2144_v11 = vmul.f32 %v3951_v54, %v3951_v54  ;;  %4755 = vst [vmem:[#allocation31_spill] sm:$0xff] %v3968_v20 }
 0x1bf   :  { %v1387_v13 = vmul.f32 %v3946_v23, %v3946_v23 }
 0x1c0   :  { %2057 = vadd.xlane.f32.xlu0 %v2029_v32  ;;  %v3956_v32 = vunpack.c.h.bf16 %v3788_v12 }
 0x1c1   :  { %2049 = vadd.xlane.f32.xlu1 %v2025_v33  ;;  %v1503_v33 = vmul.f32 %v3941_v1, %v3941_v1 }
 0x1c4   :  { %1420 = vadd.xlane.f32.xlu0 %v1390_v7  ;;  %v1500_v7 = vmul.f32 %v3956_v32, %v3956_v32 }
 0x1c5   :  { %2051 = vadd.xlane.f32.xlu1 %v2026_v47  ;;  %v3963_v47 = vunpack.c.l.bf16 %v3790_v16  ;;  %v3978_v16 = vunpack.c.h.bf16 %v3814_v45  ;;  %v3993_v45 = vunpack.c.h.bf16 %v3820_v59  ;;  %v4008_v59 = vunpack.c.l.bf16 %v3846_v41 }
 0x1c7   :  { %v2139_v12 = vmul.f32 %v3963_v47, %v3963_v47  ;;  %4757 = vst [vmem:[#allocation33_spill] sm:$0xff] %v3993_v45  ;;  %4759 = vst [vmem:[#allocation35_spill] sm:$0xff] %v4008_v59 }
 0x1c8   :  { %1533 = vadd.xlane.f32.xlu0 %v1503_v33  ;;  %v2027_v33 = vmul.f32 %v3968_v20, %v3968_v20 }
 0x1c9   :  { %1414 = vadd.xlane.f32.xlu1 %v1387_v13  ;;  %v3973_v13 = vunpack.c.h.bf16 %v3792_v17  ;;  %v3988_v17 = vunpack.c.l.bf16 %v3818_v58  ;;  %v4003_v58 = vunpack.c.h.bf16 %v3844_v37 }
 0x1cb   :  { %4756 = vst [vmem:[#allocation32_spill] sm:$0xff] %v3973_v13  ;;  %4758 = vst [vmem:[#allocation34_spill] sm:$0xff] %v4003_v58 }
 0x1cc   :  { %2175 = vadd.xlane.f32.xlu0 %v2144_v11  ;;  %v2028_v11 = vmul.f32 %v3973_v13, %v3973_v13  ;;  %v4018_v13 = vunpack.c.h.bf16 %v3848_v43 }
 0x1cd   :  { %1527 = vadd.xlane.f32.xlu1 %v1500_v7  ;;  %v3983_v7 = vunpack.c.h.bf16 %v3816_v49  ;;  %v3998_v49 = vunpack.c.h.bf16 %v3842_v35  ;;  %v4013_v35 = vunpack.c.l.bf16 %v3848_v43 }
 0x1ce   :  { %4761 = vst [vmem:[#allocation37_spill] sm:$0xff] %v4018_v13  ;;  %v2032_v27 = vmul.f32 %v4018_v13, %v4018_v13 }
 0x1cf   :  { %4760 = vst [vmem:[#allocation36_spill] sm:$0xff] %v4013_v35  ;;  %v2031_v41 = vmul.f32 %v4013_v35, %v4013_v35 }
 0x1d1   :  { %2165 = vadd.xlane.f32.xlu1 %v2139_v12  ;;  %v1389_v12 = vmul.f32 %v3978_v16, %v3978_v16 }
 0x1d5   :  { %2053 = vadd.xlane.f32.xlu1 %v2027_v33  ;;  %v1502_v33 = vmul.f32 %v3983_v7, %v3983_v7 }
 0x1d9   :  { %2055 = vadd.xlane.f32.xlu1 %v2028_v11  ;;  %v2141_v11 = vmul.f32 %v3988_v17, %v3988_v17 }
 0x1dd   :  { %1418 = vadd.xlane.f32.xlu1 %v1389_v12  ;;  %v2030_v12 = vmul.f32 %v3993_v45, %v3993_v45 }
 0x1e1   :  { %1531 = vadd.xlane.f32.xlu1 %v1502_v33  ;;  %v1391_v33 = vmul.f32 %v3998_v49, %v3998_v49 }
 0x1e5   :  { %2169 = vadd.xlane.f32.xlu1 %v2141_v11  ;;  %v1504_v11 = vmul.f32 %v4003_v58, %v4003_v58 }
 0x1e9   :  { %2059 = vadd.xlane.f32.xlu1 %v2030_v12  ;;  %v2143_v12 = vmul.f32 %v4008_v59, %v4008_v59 }
 0x1ed   :  { %1422 = vadd.xlane.f32.xlu1 %v1391_v33 }
 0x1f1   :  { %1535 = vadd.xlane.f32.xlu1 %v1504_v11 }
 0x1f5   :  { %2173 = vadd.xlane.f32.xlu1 %v2143_v12  ;;  %v1393_v45 = vpop.xlane.xlu0 %1392 }
 0x1f6   :  { %v1508_v37 = vpop.xlane.xlu1 %1507  ;;  %v1425_v33 = vmul.f32 0.0078125, %v1393_v45 }
 0x1f7   :  { %v1538_v2 = vmul.f32 0.0078125, %v1508_v37 }
 0x1f8   :  { %v1441_v20 = vadd.f32 1.1920929e-07, %v1425_v33 }
 0x1f9   :  { %2061 = vadd.xlane.f32.xlu1 %v2031_v41  ;;  %v1395_v5 = vpop.xlane.xlu0 %1394  ;;  %v1554_v51 = vadd.f32 1.1920929e-07, %v1538_v2 }
 0x1fa   :  { %v2146_v11 = vpop.xlane.xlu1 %2145  ;;  %v1426_v44 = vmul.f32 0.0078125, %v1395_v5  ;;  %3239 = vrsqrt.f32 %v1441_v20 }
 0x1fb   :  { %v2177_v45 = vmul.f32 0.0078125, %v2146_v11 }
 0x1fc   :  { %v1442_v12 = vadd.f32 1.1920929e-07, %v1426_v44 }
 0x1fd   :  { %2063 = vadd.xlane.f32.xlu1 %v2032_v27  ;;  %v1506_v42 = vpop.xlane.xlu0 %1505  ;;  %v2193_v41 = vadd.f32 1.1920929e-07, %v2177_v45 }
 0x1fe   :  { %v4024_v43 = vpop.xlane.xlu1 %2033  ;;  %v1537_v59 = vmul.f32 0.0078125, %v1506_v42  ;;  %3241 = vrsqrt.f32 %v1442_v12 }
 0x1ff   :  { %4762 = vst [vmem:[#allocation38_spill] sm:$0xff] %v4024_v43  ;;  %3243 = vrsqrt.f32 %v1554_v51 }
 0x200   :  { %v1553_v35 = vadd.f32 1.1920929e-07, %v1537_v59 }
 0x201   :  { %v2148_v33 = vpop.xlane.xlu0 %2147 }
 0x202   :  { %v4026_v37 = vpop.xlane.xlu1 %2035  ;;  %3245 = vrsqrt.f32 %v1553_v35  ;;  %v2178_v5 = vmul.f32 0.0078125, %v2148_v33 }
 0x203   :  { %4763 = vst [vmem:[#allocation39_spill] sm:$0xff] %v4026_v37  ;;  %3247 = vrsqrt.f32 %v2193_v41 }
 0x204   :  { %v3240_v58 = vpop.eup %3239  ;;  %v2194_v13 = vadd.f32 1.1920929e-07, %v2178_v5 }
 0x205   :  { %v1510_v20 = vpop.xlane.xlu0 %1509  ;;  %v4029_v43 = vmul.f32 %v3240_v58, %v3676_v30 }
 0x206   :  { %v1397_v44 = vpop.xlane.xlu1 %1396  ;;  %v1539_v27 = vmul.f32 0.0078125, %v1510_v20  ;;  %3249 = vrsqrt.f32 %v2194_v13 }
 0x207   :  { %v1427_v2 = vmul.f32 0.0078125, %v1397_v44  ;;  %1617 = vrot.lane.b32.xlu0 %v4029_v43, %s3563_s3 }
 0x208   :  { %v1555_v42 = vadd.f32 1.1920929e-07, %v1539_v27  ;;  %v3242_v51 = vpop.eup %3241 }
 0x209   :  { %v2150_v59 = vpop.xlane.xlu0 %2149  ;;  %v1443_v11 = vadd.f32 1.1920929e-07, %v1427_v2  ;;  %v3244_v45 = vpop.eup %3243  ;;  %v4034_v33 = vmul.f32 %v3242_v51, %v3672_v28 }
 0x20a   :  { %v1399_v35 = vpop.xlane.xlu1 %1398  ;;  %3251 = vrsqrt.f32 %v1555_v42  ;;  %v4044_v44 = vmul.f32 %v3244_v45, %v3674_v29  ;;  %v2179_v42 = vmul.f32 0.0078125, %v2150_v59 }
 0x20b   :  { %v1428_v12 = vmul.f32 0.0078125, %v1399_v35  ;;  %3253 = vrsqrt.f32 %v1443_v11 }
 0x20c   :  { %v3246_v41 = vpop.eup %3245 }
 0x20d   :  { %v2152_v5 = vpop.xlane.xlu0 %2151  ;;  %v4039_v58 = vmul.f32 %v3246_v41, %v3686_v39  ;;  %v1444_v13 = vadd.f32 1.1920929e-07, %v1428_v12  ;;  %v3248_v28 = vpop.eup %3247 }
 0x20e   :  { %v1512_v30 = vpop.xlane.xlu1 %1511  ;;  %1619 = vrot.lane.b32.xlu1 %v4034_v33, %s3563_s3  ;;  %v4051_v11 = vmul.f32 %v3248_v28, %v3678_v31  ;;  %v2180_v59 = vmul.f32 0.0078125, %v2152_v5 }
 0x20f   :  { %v1540_v20 = vmul.f32 0.0078125, %v1512_v30  ;;  %1697 = vrot.lane.b32.xlu0 %v4039_v58, %s3563_s3  ;;  %3255 = vrsqrt.f32 %v1444_v13 }
 0x210   :  { %v3250_v35 = vpop.eup %3249 }
 0x211   :  { %v1401_v2 = vpop.xlane.xlu0 %1400  ;;  %v1556_v39 = vadd.f32 1.1920929e-07, %v1540_v20  ;;  %v4063_v31 = vmul.f32 %v3250_v35, %v3694_v50 }
 0x212   :  { %v4046_v27 = vpop.xlane.xlu1 %2037  ;;  %1699 = vrot.lane.b32.xlu1 %v4044_v44, %s3563_s3  ;;  %v1429_v51 = vmul.f32 0.0078125, %v1401_v2 }
 0x213   :  { %4764 = vst [vmem:[#allocation40_spill] sm:$0xff] %v4046_v27  ;;  %v2195_v27 = vadd.f32 1.1920929e-07, %v2179_v42  ;;  %3257 = vrsqrt.f32 %v1556_v39 }
 0x214   :  { %v3252_v12 = vpop.eup %3251  ;;  %v1445_v41 = vadd.f32 1.1920929e-07, %v1429_v51 }
 0x215   :  { %v1514_v29 = vpop.xlane.xlu0 %1513  ;;  %v4058_v45 = vmul.f32 %v3252_v12, %v3702_v56  ;;  %v3254_v20 = vpop.eup %3253  ;;  %v2196_v56 = vadd.f32 1.1920929e-07, %v2180_v59 }
 0x216   :  { %v4053_v30 = vpop.xlane.xlu1 %2039  ;;  %2337 = vrot.lane.b32.xlu1 %v4051_v11, %s3563_s3  ;;  %v1541_v13 = vmul.f32 0.0078125, %v1514_v29  ;;  %3259 = vrsqrt.f32 %v1445_v41  ;;  %v4068_v5 = vmul.f32 %v3254_v20, %v3706_v62 }
 0x217   :  { %4765 = vst [vmem:[#allocation41_spill] sm:$0xff] %v4053_v30  ;;  %1701 = vrot.lane.b32.xlu0 %v4058_v45, %s3563_s3  ;;  %3261 = vrsqrt.f32 %v2195_v27 }
 0x218   :  { %v1557_v28 = vadd.f32 1.1920929e-07, %v1541_v13 }
 0x219   :  { %v2156_v51 = vpop.xlane.xlu0 %2155  ;;  %v3256_v39 = vpop.eup %3255 }
 0x21a   :  { %v1403_v2 = vpop.xlane.xlu1 %1402  ;;  %2339 = vrot.lane.b32.xlu1 %v4063_v31, %s3563_s3  ;;  %3263 = vrsqrt.f32 %v1557_v28  ;;  %v4073_v13 = vmul.f32 %v3256_v39, %v3720_v8 }
 0x21b   :  { %v1430_v42 = vmul.f32 0.0078125, %v1403_v2  ;;  %3265 = vrsqrt.f32 %v2196_v56 }
 0x21d   :  { %v1446_v12 = vadd.f32 1.1920929e-07, %v1430_v42  ;;  %v1405_v29 = vpop.xlane.xlu0 %1404  ;;  %v3258_v27 = vpop.eup %3257 }
 0x21e   :  { %v1516_v41 = vpop.xlane.xlu1 %1515  ;;  %1621 = vrot.lane.b32.xlu1 %v4068_v5, %s3563_s3  ;;  %v1431_v35 = vmul.f32 0.0078125, %v1405_v29  ;;  %v4081_v56 = vmul.f32 %v3258_v27, %v3726_v15 }
 0x21f   :  { %v1542_v50 = vmul.f32 0.0078125, %v1516_v41  ;;  %3267 = vrsqrt.f32 %v1446_v12 }
 0x220   :  { %v1447_v59 = vadd.f32 1.1920929e-07, %v1431_v35  ;;  %v3260_v2 = vpop.eup %3259 }
 0x221   :  { %v1518_v62 = vpop.xlane.xlu0 %1517  ;;  %v1558_v20 = vadd.f32 1.1920929e-07, %v1542_v50  ;;  %v4078_v37 = vmul.f32 %v3260_v2, %v3740_v26  ;;  %v3262_v8 = vpop.eup %3261  ;;  %v2182_v50 = vmul.f32 0.0078125, %v2156_v51 }
 0x222   :  { %v2154_v28 = vpop.xlane.xlu1 %2153  ;;  %1623 = vrot.lane.b32.xlu1 %v4073_v13, %s3563_s3  ;;  %v1543_v30 = vmul.f32 0.0078125, %v1518_v62  ;;  %3269 = vrsqrt.f32 %v1447_v59  ;;  %v4093_v15 = vmul.f32 %v3262_v8, %v3716_v6 }
 0x223   :  { %v2181_v42 = vmul.f32 0.0078125, %v2154_v28  ;;  %1625 = vrot.lane.b32.xlu0 %v4078_v37, %s3563_s3  ;;  %3271 = vrsqrt.f32 %v1558_v20  ;;  %v2198_v51 = vadd.f32 1.1920929e-07, %v2182_v50 }
 0x224   :  { %v1559_v39 = vadd.f32 1.1920929e-07, %v1543_v30  ;;  %v3264_v12 = vpop.eup %3263 }
 0x225   :  { %v2160_v29 = vpop.xlane.xlu0 %2159  ;;  %v2197_v26 = vadd.f32 1.1920929e-07, %v2181_v42  ;;  %v4090_v35 = vmul.f32 %v3264_v12, %v3750_v36  ;;  %v3266_v30 = vpop.eup %3265 }
 0x226   :  { %v4085_v41 = vpop.xlane.xlu1 %2041  ;;  %1703 = vrot.lane.b32.xlu1 %v4081_v56, %s3563_s3  ;;  %3273 = vrsqrt.f32 %v1559_v39  ;;  %v4102_v36 = vmul.f32 %v3266_v30, %v3728_v18 }
 0x227   :  { %4766 = vst [vmem:[#allocation42_spill] sm:$0xff] %v4085_v41  ;;  %1705 = vrot.lane.b32.xlu0 %v4090_v35, %s3563_s3  ;;  %3275 = vrsqrt.f32 %v2197_v26  ;;  %v3206_v41 = vld [vmem:[#allocation6 + $0x100] ss:$24 sps:$4 sm:$0xff]  }
 0x228   :  { %3277 = vrsqrt.f32 %v2198_v51  ;;  %v3193_v51 = vld [vmem:[#allocation6 + $0x14] ss:$24 sps:$4 sm:$0xff]  }
 0x229   :  { %v1409_v59 = vpop.xlane.xlu0 %1408  ;;  %v3268_v28 = vpop.eup %3267  ;;  %975 = vmatprep.subr.bf16.mxu0 %v3193_v51  ;;  %3026 = vmatprep.subr.bf16.mxu1 %v3193_v51 }
 0x22a   :  { %v4097_v27 = vpop.xlane.xlu1 %2043  ;;  %2341 = vrot.lane.b32.xlu1 %v4093_v15, %s3563_s3  ;;  %v1433_v2 = vmul.f32 0.0078125, %v1409_v59  ;;  %v4110_v50 = vmul.f32 %v3268_v28, %v3772_v57  ;;  %v3191_v57 = vld [vmem:[#allocation6 + $0x10] ss:$24 sps:$4 sm:$0xff]  }
 0x22b   :  { %4767 = vst [vmem:[#allocation43_spill] sm:$0xff] %v4097_v27  ;;  %976 = vmatpush1.bf16.msra.mxu0 %v3191_v57  ;;  %3042 = vmatpush1.bf16.msra.mxu1 %v3191_v57 }
 0x22c   :  { %v1449_v62 = vadd.f32 1.1920929e-07, %v1433_v2  ;;  %v3270_v6 = vpop.eup %3269 }
 0x22d   :  { %v1522_v42 = vpop.xlane.xlu0 %1521  ;;  %v4107_v12 = vmul.f32 %v3270_v6, %v3777_v61  ;;  %v3272_v26 = vpop.eup %3271 }
 0x22e   :  { %v1407_v20 = vpop.xlane.xlu1 %1406  ;;  %2343 = vrot.lane.b32.xlu1 %v4102_v36, %s3563_s3  ;;  %v1545_v39 = vmul.f32 0.0078125, %v1522_v42  ;;  %3279 = vrsqrt.f32 %v1449_v62  ;;  %v4122_v28 = vmul.f32 %v3272_v26, %v3782_v0  ;;  %v3194_v26 = vld [vmem:[#allocation6 + $0x40] ss:$24 sps:$4 sm:$0xff]  }
 0x22f   :  { %v1432_v8 = vmul.f32 0.0078125, %v1407_v20  ;;  %1629 = vrot.lane.b32.xlu0 %v4107_v12, %s3563_s3 }
 0x230   :  { %v1561_v30 = vadd.f32 1.1920929e-07, %v1545_v39  ;;  %v3274_v59 = vpop.eup %3273  ;;  %v2184_v39 = vmul.f32 0.0078125, %v2160_v29  ;;  %v3199_v29 = vld [vmem:[#allocation6 + $0x74] ss:$24 sps:$4 sm:$0xff]  }
 0x231   :  { %v1448_v18 = vadd.f32 1.1920929e-07, %v1432_v8  ;;  %v4114_v27 = vpop.xlane.xlu0 %2163  ;;  %v4119_v62 = vmul.f32 %v3274_v59, %v3795_v19  ;;  %v3276_v6 = vpop.eup %3275  ;;  %v3196_v19 = vld [vmem:[#allocation6 + $0x44] ss:$24 sps:$4 sm:$0xff]  }
 0x232   :  { %v1520_v2 = vpop.xlane.xlu1 %1519  ;;  %1627 = vrot.lane.b32.xlu1 %v4110_v50, %s3563_s3  ;;  %977 = vmatprep.subr.bf16.mxu0 %v3196_v19  ;;  %v2200_v57 = vadd.f32 1.1920929e-07, %v2184_v39  ;;  %v3200_v39 = vld [vmem:[#allocation6 + $0xa0] ss:$24 sps:$4 sm:$0xff]  }
 0x233   :  { %3281 = vrsqrt.f32 %v1448_v18  ;;  %v1544_v61 = vmul.f32 0.0078125, %v1520_v2  ;;  %1709 = vrot.lane.b32.xlu0 %v4119_v62, %s3563_s3  ;;  %v4131_v18 = vmul.f32 %v3276_v6, %v3800_v22  ;;  %3027 = vmatprep.subr.bf16.mxu1 %v3196_v19  ;;  %v3197_v6 = vld [vmem:[#allocation6 + $0x70] ss:$24 sps:$4 sm:$0xff]  }
 0x234   :  { %3283 = vrsqrt.f32 %v1561_v30  ;;  %v3278_v30 = vpop.eup %3277  ;;  %978 = vmatpush1.bf16.msra.mxu0 %v3194_v26  ;;  %3043 = vmatpush1.bf16.msra.mxu1 %v3194_v26 }
 0x235   :  { %v1560_v20 = vadd.f32 1.1920929e-07, %v1544_v61  ;;  %v4126_v8 = vpop.xlane.xlu0 %1412  ;;  %979 = vmatprep.subr.bf16.mxu0 %v3199_v29  ;;  %3028 = vmatprep.subr.bf16.mxu1 %v3199_v29 }
 0x236   :  { %v2158_v42 = vpop.xlane.xlu1 %2157  ;;  %1707 = vrot.lane.b32.xlu1 %v4122_v28, %s3563_s3 }
 0x237   :  { %3285 = vrsqrt.f32 %v1560_v20  ;;  %v2183_v0 = vmul.f32 0.0078125, %v2158_v42  ;;  %v4143_v20 = vmul.f32 %v3278_v30, %v3768_v55 }
 0x238   :  { %v3280_v2 = vpop.eup %3279  ;;  %980 = vmatpush1.bf16.msra.mxu0 %v3197_v6  ;;  %3044 = vmatpush1.bf16.msra.mxu1 %v3197_v6  ;;  %v3203_v6 = vld [vmem:[#allocation6 + $0xd0] ss:$24 sps:$4 sm:$0xff]  }
 0x239   :  { %v2199_v59 = vadd.f32 1.1920929e-07, %v2183_v0  ;;  %v4135_v61 = vpop.xlane.xlu0 %1525  ;;  %v4140_v22 = vmul.f32 %v3280_v2, %v3823_v60  ;;  %4769 = vst [vmem:[#allocation45_spill] sm:$0xff] %v4143_v20  ;;  %v3202_v60 = vld [vmem:[#allocation6 + $0xa4] ss:$24 sps:$4 sm:$0xff]  }
 0x23a   :  { %v4133_v51 = vpop.xlane.xlu1 %2045  ;;  %2345 = vrot.lane.b32.xlu1 %v4131_v18, %s3563_s3  ;;  %981 = vmatprep.subr.bf16.mxu0 %v3202_v60 }
 0x23b   :  { %4768 = vst [vmem:[#allocation44_spill] sm:$0xff] %v4133_v51  ;;  %3287 = vrsqrt.f32 %v2199_v59  ;;  %1633 = vrot.lane.b32.xlu0 %v4140_v22, %s3563_s3  ;;  %3029 = vmatprep.subr.bf16.mxu1 %v3202_v60 }
 0x23c   :  { %3289 = vrsqrt.f32 %v2200_v57  ;;  %982 = vmatpush1.bf16.msra.mxu0 %v3200_v39  ;;  %3045 = vmatpush1.bf16.msra.mxu1 %v3200_v39  ;;  %v3205_v57 = vld [vmem:[#allocation6 + $0xd4] ss:$24 sps:$4 sm:$0xff]   ;;  %v3208_v39 = vld [vmem:[#allocation6 + $0x104] ss:$24 sps:$4 sm:$0xff]  }
 0x23d   :  { %v3282_v42 = vpop.eup %3281  ;;  %v4149_v26 = vpop.xlane.xlu0 %2167  ;;  %983 = vmatprep.subr.bf16.mxu0 %v3205_v57  ;;  %3030 = vmatprep.subr.bf16.mxu1 %v3205_v57 }
 0x23e   :  { %v3284_v19 = vpop.eup %3283  ;;  %v4147_v0 = vpop.xlane.xlu1 %2047  ;;  %2347 = vrot.lane.b32.xlu1 %v4143_v20, %s3563_s3  ;;  %v4157_v30 = vmul.f32 %v3282_v42, %v3838_v4  ;;  %v2186_v42 = vmul.f32 0.0078125, %v4114_v27  ;;  %v1435_v27 = vmul.f32 0.0078125, %v4126_v8 }
 0x23f   :  { %4770 = vst [vmem:[#allocation46_spill] sm:$0xff] %v4147_v0  ;;  %v4154_v55 = vmul.f32 %v3284_v19, %v3833_v10 }
 0x240   :  { %984 = vmatpush1.bf16.msra.mxu0 %v3203_v6  ;;  %3046 = vmatpush1.bf16.msra.mxu1 %v3203_v6  ;;  %v2202_v57 = vadd.f32 1.1920929e-07, %v2186_v42  ;;  %v1451_v8 = vadd.f32 1.1920929e-07, %v1435_v27  ;;  %v1547_v42 = vmul.f32 0.0078125, %v4135_v61 }
 0x241   :  { %4771 = vst [vmem:[#allocation47_spill] sm:$0xff] %v4154_v55  ;;  %v3286_v59 = vpop.eup %3285  ;;  %1713 = vrot.lane.b32.xlu0 %v4154_v55, %s3563_s3  ;;  %v1417_v29 = vpop.xlane.xlu0 %1416  ;;  %985 = vmatprep.subr.bf16.mxu0 %v3208_v39 }
 0x242   :  { %v1411_v2 = vpop.xlane.xlu1 %1410  ;;  %1631 = vrot.lane.b32.xlu1 %v4157_v30, %s3563_s3  ;;  %v4164_v19 = vmul.f32 %v3286_v59, %v3856_v48  ;;  %3031 = vmatprep.subr.bf16.mxu1 %v3208_v39 }
 0x243   :  { %v1434_v10 = vmul.f32 0.0078125, %v1411_v2 }
 0x244   :  { %986 = vmatpush1.bf16.msra.mxu0 %v3206_v41  ;;  %3047 = vmatpush1.bf16.msra.mxu1 %v3206_v41  ;;  %v3214_v41 = vld [vmem:[#allocation6 + $0x164] ss:$24 sps:$4 sm:$0xff]  }
 0x245   :  { %v3288_v4 = vpop.eup %3287  ;;  %v1450_v60 = vadd.f32 1.1920929e-07, %v1434_v10  ;;  %v1530_v51 = vpop.xlane.xlu0 %1529 }
 0x246   :  { %v1524_v0 = vpop.xlane.xlu1 %1523  ;;  %1711 = vrot.lane.b32.xlu1 %v4164_v19, %s3563_s3  ;;  %v4170_v48 = vmul.f32 %v3288_v4, %v3866_v9  ;;  %v3290_v59 = vpop.eup %3289  ;;  %v3209_v9 = vld [vmem:[#allocation6 + $0x130] ss:$24 sps:$4 sm:$0xff]  }
 0x247   :  { %3291 = vrsqrt.f32 %v1450_v60  ;;  %v1546_v2 = vmul.f32 0.0078125, %v1524_v0  ;;  %v3211_v0 = vld [vmem:[#allocation6 + $0x134] ss:$24 sps:$4 sm:$0xff]   ;;  %v4178_v4 = vmul.f32 %v3290_v59, %v3805_v34  ;;  %v3212_v34 = vld [vmem:[#allocation6 + $0x160] ss:$24 sps:$4 sm:$0xff]   ;;  %v1563_v59 = vadd.f32 1.1920929e-07, %v1547_v42 }
 0x248   :  { %987 = vmatprep.subr.bf16.mxu0 %v3211_v0  ;;  %3032 = vmatprep.subr.bf16.mxu1 %v3211_v0  ;;  %v3217_v0 = vld [vmem:[#allocation6 + $0x194] ss:$24 sps:$4 sm:$0xff]  }
 0x249   :  { %v1562_v10 = vadd.f32 1.1920929e-07, %v1546_v2  ;;  %v4173_v55 = vpop.xlane.xlu0 %2171  ;;  %988 = vmatpush1.bf16.msra.mxu0 %v3209_v9  ;;  %3048 = vmatpush1.bf16.msra.mxu1 %v3209_v9 }
 0x24a   :  { %v2162_v20 = vpop.xlane.xlu1 %2161  ;;  %2349 = vrot.lane.b32.xlu1 %v4170_v48, %s3563_s3  ;;  %989 = vmatprep.subr.bf16.mxu0 %v3214_v41 }
 0x24b   :  { %3293 = vrsqrt.f32 %v1562_v10  ;;  %v2185_v6 = vmul.f32 0.0078125, %v2162_v20  ;;  %3033 = vmatprep.subr.bf16.mxu1 %v3214_v41 }
 0x24c   :  { %3295 = vrsqrt.f32 %v2202_v57  ;;  %v1437_v57 = vmul.f32 0.0078125, %v1417_v29 }
 0x24d   :  { %v2201_v60 = vadd.f32 1.1920929e-07, %v2185_v6  ;;  %v4183_v2 = vpop.xlane.xlu0 %2057  ;;  %990 = vmatpush1.bf16.msra.mxu0 %v3212_v34  ;;  %3049 = vmatpush1.bf16.msra.mxu1 %v3212_v34  ;;  %v3215_v6 = vld [vmem:[#allocation6 + $0x190] ss:$24 sps:$4 sm:$0xff]  }
 0x24e   :  { %v4181_v39 = vpop.xlane.xlu1 %2049  ;;  %4773 = vst [vmem:[#allocation49_spill] sm:$0xff] %v4183_v2  ;;  %2351 = vrot.lane.b32.xlu1 %v4178_v4, %s3563_s3  ;;  %991 = vmatprep.subr.bf16.mxu0 %v3217_v0 }
 0x24f   :  { %4772 = vst [vmem:[#allocation48_spill] sm:$0xff] %v4181_v39  ;;  %3297 = vrsqrt.f32 %v2201_v60  ;;  %v1453_v60 = vadd.f32 1.1920929e-07, %v1437_v57  ;;  %3034 = vmatprep.subr.bf16.mxu1 %v3217_v0 }
 0x250   :  { %3299 = vrsqrt.f32 %v1451_v8  ;;  %v1549_v8 = vmul.f32 0.0078125, %v1530_v51 }
 0x251   :  { %v3292_v20 = vpop.eup %3291  ;;  %v1421_v27 = vpop.xlane.xlu0 %1420  ;;  %3301 = vrsqrt.f32 %v1563_v59  ;;  %992 = vmatpush1.bf16.msra.mxu0 %v3215_v6  ;;  %3050 = vmatpush1.bf16.msra.mxu1 %v3215_v6 }
 0x252   :  { %v4187_v61 = vpop.xlane.xlu1 %2051  ;;  %v4190_v10 = vmul.f32 %v3292_v20, %v3896_v63  ;;  %v3220_v63 = vld [vmem:[#allocation6 + $0x1c4] ss:$24 sps:$4 sm:$0xff]   ;;  %v3218_v20 = vld [vmem:[#allocation6 + $0x1c0] ss:$24 sps:$4 sm:$0xff]   ;;  %3303 = vrsqrt.f32 %v1453_v60  ;;  %v1565_v59 = vadd.f32 1.1920929e-07, %v1549_v8  ;;  %v1439_v51 = vmul.f32 0.0078125, %v1421_v27 }
 0x253   :  { %4774 = vst [vmem:[#allocation50_spill] sm:$0xff] %v4187_v61  ;;  %993 = vmatprep.subr.bf16.mxu0 %v3220_v63  ;;  %3035 = vmatprep.subr.bf16.mxu1 %v3220_v63  ;;  %v2188_v60 = vmul.f32 0.0078125, %v4149_v26  ;;  %v3226_v26 = vld [vmem:[#allocation6 + $0x224] ss:$24 sps:$4 sm:$0xff]  }
 0x254   :  { %1635 = vrot.lane.b32.xlu1 %v4190_v10, %s3563_s3 }
 0x255   :  { %v3294_v9 = vpop.eup %3293  ;;  %v1534_v2 = vpop.xlane.xlu0 %1533  ;;  %994 = vmatpush1.bf16.msra.mxu0 %v3218_v20  ;;  %3051 = vmatpush1.bf16.msra.mxu1 %v3218_v20  ;;  %v3224_v20 = vld [vmem:[#allocation6 + $0x220] ss:$24 sps:$4 sm:$0xff]  }
 0x256   :  { %v1415_v29 = vpop.xlane.xlu1 %1414  ;;  %v4195_v42 = vmul.f32 %v3294_v9, %v3906_v14  ;;  %v3296_v41 = vpop.eup %3295  ;;  %v3223_v9 = vld [vmem:[#allocation6 + $0x1f4] ss:$24 sps:$4 sm:$0xff]  }
 0x257   :  { %v1436_v34 = vmul.f32 0.0078125, %v1415_v29  ;;  %v4203_v6 = vmul.f32 %v3296_v41, %v3851_v52  ;;  %995 = vmatprep.subr.bf16.mxu0 %v3223_v9  ;;  %3036 = vmatprep.subr.bf16.mxu1 %v3223_v9  ;;  %v3227_v9 = vld [vmem:[#allocation6 + $0x250] ss:$24 sps:$4 sm:$0xff]  }
 0x258   :  { %4775 = vst [vmem:[#allocation51_spill] sm:$0xff] %v4195_v42  ;;  %1715 = vrot.lane.b32.xlu1 %v4195_v42, %s3563_s3  ;;  %v3221_v42 = vld [vmem:[#allocation6 + $0x1f0] ss:$24 sps:$4 sm:$0xff]  }
 0x259   :  { %v3298_v61 = vpop.eup %3297  ;;  %v1452_v57 = vadd.f32 1.1920929e-07, %v1436_v34  ;;  %v2176_v52 = vpop.xlane.xlu0 %2175  ;;  %996 = vmatpush1.bf16.msra.mxu0 %v3221_v42  ;;  %3052 = vmatpush1.bf16.msra.mxu1 %v3221_v42  ;;  %v3229_v42 = vld [vmem:[#allocation6 + $0x254] ss:$24 sps:$4 sm:$0xff]  }
 0x25a   :  { %v1528_v0 = vpop.xlane.xlu1 %1527  ;;  %v4200_v14 = vmul.f32 %v3298_v61, %v3916_v38  ;;  %v3300_v29 = vpop.eup %3299  ;;  %v1455_v38 = vadd.f32 1.1920929e-07, %v1439_v51  ;;  %v1551_v61 = vmul.f32 0.0078125, %v1534_v2  ;;  %997 = vmatprep.subr.bf16.mxu0 %v3226_v26  ;;  %v2192_v2 = vmul.f32 0.0078125, %v2176_v52  ;;  %3037 = vmatprep.subr.bf16.mxu1 %v3226_v26 }
 0x25b   :  { %3305 = vrsqrt.f32 %v1452_v57  ;;  %v1548_v39 = vmul.f32 0.0078125, %v1528_v0  ;;  %v4211_v63 = vmul.f32 %v3300_v29, %v3861_v3  ;;  %v3302_v41 = vpop.eup %3301  ;;  %v2204_v57 = vadd.f32 1.1920929e-07, %v2188_v60 }
 0x25c   :  { %2353 = vrot.lane.b32.xlu0 %v4200_v14, %s3563_s3  ;;  %2355 = vrot.lane.b32.xlu1 %v4203_v6, %s3563_s3  ;;  %3307 = vrsqrt.f32 %v1565_v59  ;;  %v4218_v3 = vmul.f32 %v3302_v41, %v3871_v21  ;;  %v3304_v0 = vpop.eup %3303  ;;  %v2208_v60 = vadd.f32 1.1920929e-07, %v2192_v2 }
 0x25d   :  { %v1564_v27 = vadd.f32 1.1920929e-07, %v1548_v39  ;;  %v1567_v39 = vadd.f32 1.1920929e-07, %v1551_v61  ;;  %998 = vmatpush1.bf16.msra.mxu0 %v3224_v20  ;;  %3053 = vmatpush1.bf16.msra.mxu1 %v3224_v20  ;;  %v4225_v21 = vmul.f32 %v3304_v0, %v3891_v40 }
 0x25e   :  { %v2166_v8 = vpop.xlane.xlu1 %2165  ;;  %999 = vmatprep.subr.bf16.mxu0 %v3229_v42  ;;  %3038 = vmatprep.subr.bf16.mxu1 %v3229_v42 }
 0x25f   :  { %3309 = vrsqrt.f32 %v1564_v27  ;;  %v2187_v34 = vmul.f32 0.0078125, %v2166_v8  ;;  %v3232_v27 = vld [vmem:[#allocation6 + $0x284] ss:$24 sps:$4 sm:$0xff]   ;;  %v3230_v8 = vld [vmem:[#allocation6 + $0x280] ss:$24 sps:$4 sm:$0xff]  }
 0x260   :  { %1637 = vrot.lane.b32.xlu0 %v4211_v63, %s3563_s3  ;;  %3311 = vrsqrt.f32 %v1455_v38 }
 0x261   :  { %v2203_v59 = vadd.f32 1.1920929e-07, %v2187_v34  ;;  %1000 = vmatpush1.bf16.msra.mxu0 %v3227_v9  ;;  %3054 = vmatpush1.bf16.msra.mxu1 %v3227_v9  ;;  %v3235_v34 = vld [vmem:[#allocation6 + $0x2b4] ss:$24 sps:$4 sm:$0xff]   ;;  %v3238_v9 = vld [vmem:[#allocation6 + $0x2e4] ss:$24 sps:$4 sm:$0xff]  }
 0x262   :  { %v4215_v51 = vpop.xlane.xlu1 %2053  ;;  %1001 = vmatprep.subr.bf16.mxu0 %v3232_v27  ;;  %3039 = vmatprep.subr.bf16.mxu1 %v3232_v27  ;;  %v3236_v27 = vld [vmem:[#allocation6 + $0x2e0] ss:$24 sps:$4 sm:$0xff]  }
 0x263   :  { %4776 = vst [vmem:[#allocation52_spill] sm:$0xff] %v4215_v51  ;;  %3313 = vrsqrt.f32 %v2203_v59 }
 0x264   :  { %3315 = vrsqrt.f32 %v2204_v57  ;;  %1717 = vrot.lane.b32.xlu0 %v4218_v3, %s3563_s3 }
 0x265   :  { %v3306_v29 = vpop.eup %3305  ;;  %3317 = vrsqrt.f32 %v1567_v39  ;;  %1002 = vmatpush1.bf16.msra.mxu0 %v3230_v8  ;;  %3055 = vmatpush1.bf16.msra.mxu1 %v3230_v8  ;;  %v3233_v39 = vld [vmem:[#allocation6 + $0x2b0] ss:$24 sps:$4 sm:$0xff]  }
 0x266   :  { %v4222_v38 = vpop.xlane.xlu1 %2055  ;;  %v4228_v61 = vmul.f32 %v3306_v29, %v3946_v23  ;;  %v3308_v52 = vpop.eup %3307  ;;  %3319 = vrsqrt.f32 %v2208_v60  ;;  %1003 = vmatprep.subr.bf16.mxu0 %v3235_v34  ;;  %3040 = vmatprep.subr.bf16.mxu1 %v3235_v34 }
 0x267   :  { %4777 = vst [vmem:[#allocation53_spill] sm:$0xff] %v4222_v38  ;;  %v4235_v41 = vmul.f32 %v3308_v52, %v3901_v25  ;;  %v2190_v52 = vmul.f32 0.0078125, %v4173_v55 }
 0x268   :  { %1641 = vrot.lane.b32.xlu0 %v4225_v21, %s3563_s3  ;;  %1639 = vrot.lane.b32.xlu1 %v4228_v61, %s3563_s3 }
 0x269   :  { %v3310_v26 = vpop.eup %3309  ;;  %1004 = vmatpush1.bf16.msra.mxu0 %v3233_v39  ;;  %3056 = vmatpush1.bf16.msra.mxu1 %v3233_v39  ;;  %v2206_v55 = vadd.f32 1.1920929e-07, %v2190_v52 }
 0x26a   :  { %v1419_v40 = vpop.xlane.xlu1 %1418  ;;  %v4238_v23 = vmul.f32 %v3310_v26, %v3956_v32  ;;  %v3312_v20 = vpop.eup %3311  ;;  %1005 = vmatprep.subr.bf16.mxu0 %v3238_v9  ;;  %3041 = vmatprep.subr.bf16.mxu1 %v3238_v9  ;;  %v4274_v9 = vld [vmem:[#allocation9] sm:$0xff] }
 0x26b   :  { %v1438_v57 = vmul.f32 0.0078125, %v1419_v40  ;;  %v4245_v32 = vmul.f32 %v3312_v20, %v3931_v53 }
 0x26c   :  { %1721 = vrot.lane.b32.xlu0 %v4235_v41, %s3563_s3  ;;  %1719 = vrot.lane.b32.xlu1 %v4238_v23, %s3563_s3 }
 0x26d   :  { %v3314_v2 = vpop.eup %3313  ;;  %v1454_v59 = vadd.f32 1.1920929e-07, %v1438_v57  ;;  %1006 = vmatpush1.bf16.msra.mxu0 %v3236_v27  ;;  %3057 = vmatpush1.bf16.msra.mxu1 %v3236_v27  ;;  %v3367_v57 = vld [vmem:[#allocation3] ss:$8 sps:$4 sm:$0xff]  }
 0x26e   :  { %v3316_v25 = vpop.eup %3315  ;;  %v1532_v42 = vpop.xlane.xlu1 %1531  ;;  %v4248_v0 = vmul.f32 %v3314_v2, %v3963_v47  ;;  %v3369_v2 = vld [vmem:[#allocation3 + $0x14] ss:$8 sps:$4 sm:$0xff]  }
 0x26f   :  { %v3318_v29 = vpop.eup %3317  ;;  %3321 = vrsqrt.f32 %v1454_v59  ;;  %v1550_v60 = vmul.f32 0.0078125, %v1532_v42  ;;  %v4259_v26 = vmul.f32 %v3316_v25, %v3881_v24  ;;  %v3370_v59 = vld [vmem:[#allocation3 + $0x54] ss:$8 sps:$4 sm:$0xff]   ;;  %v4272_v42 = vld [vmem:[#allocation8] sm:$0xff] }
 0x270   :  { %1645 = vrot.lane.b32.xlu0 %v4245_v32, %s3563_s3  ;;  %2357 = vrot.lane.b32.xlu1 %v4248_v0, %s3563_s3  ;;  %v4256_v8 = vmul.f32 %v3318_v29, %v3941_v1  ;;  %v3320_v40 = vpop.eup %3319  ;;  %v3368_v1 = vld [vmem:[#allocation3 + $0x40] ss:$8 sps:$4 sm:$0xff]   ;;  %v1601_v52 = vmul.f32 %v4029_v43, %v4272_v42 }
 0x271   :  { %v1566_v53 = vadd.f32 1.1920929e-07, %v1550_v60  ;;  %1008 = vmatmul.mubr.bf16.vlgmr.msra.gmra.mrb[32].mxu0 %v3367_v57  ;;  %1048 = vmatmul.mubr.bf16.vlgmr.msra.gmra.mrb[32].mxu1 %v3368_v1  ;;  %v4268_v24 = vmul.f32 %v3320_v40, %v3951_v54  ;;  %v3373_v1 = vld [vmem:[#allocation3 + $0x24] ss:$8 sps:$4 sm:$0xff]  }
 0x272   :  { %v2170_v47 = vpop.xlane.xlu1 %2169  ;;  %1017 = vmatprep.mubr.bf16.mxu0 %v3369_v2  ;;  %1057 = vmatprep.mubr.bf16.mxu1 %v3370_v59  ;;  %v3374_v2 = vld [vmem:[#allocation3 + $0x64] ss:$8 sps:$4 sm:$0xff]  }
 0x273   :  { %3323 = vrsqrt.f32 %v1566_v53  ;;  %v2189_v34 = vmul.f32 0.0078125, %v2170_v47  ;;  %4779 = vst [vmem:[#allocation55_spill] sm:$0xff] %v4268_v24 }
 0x274   :  { %1725 = vrot.lane.b32.xlu0 %v4256_v8, %s3563_s3  ;;  %2359 = vrot.lane.b32.xlu1 %v4259_v26, %s3563_s3 }
 0x275   :  { %v2205_v20 = vadd.f32 1.1920929e-07, %v2189_v34  ;;  %v3371_v34 = vld [vmem:[#allocation3 + $0x10] ss:$8 sps:$4 sm:$0xff]  }
 0x276   :  { %v4265_v39 = vpop.xlane.xlu1 %2059 }
 0x277   :  { %4778 = vst [vmem:[#allocation54_spill] sm:$0xff] %v4265_v39  ;;  %3325 = vrsqrt.f32 %v2205_v20  ;;  %v4331_v39 = vld [vmem:[#allocation8 + $0x20] sm:$0xff] }
 0x278   :  { %2367 = vrot.lane.b32.xlu0 %v4268_v24, %s3563_s3  ;;  %3327 = vrsqrt.f32 %v2206_v55  ;;  %v3372_v55 = vld [vmem:[#allocation3 + $0x50] ss:$8 sps:$4 sm:$0xff]  }
 0x279   :  { %v3322_v25 = vpop.eup %3321  ;;  %v1618_v27 = vpop.permute.xlu0 %1617  ;;  %1018 = vmatmul.mubr.bf16.gmra.mrb[36].mxu0 %v3371_v34  ;;  %1058 = vmatmul.mubr.bf16.gmra.mrb[36].mxu1 %v3372_v55  ;;  %v3376_v34 = vld [vmem:[#allocation3 + $0x60] ss:$8 sps:$4 sm:$0xff]  }
 0x27a   :  { %v1423_v29 = vpop.xlane.xlu1 %1422  ;;  %v4277_v60 = vmul.f32 %v3322_v25, %v3978_v16  ;;  %v1649_v53 = vmul.f32 %v1618_v27, %v4274_v9  ;;  %1027 = vmatprep.mubr.bf16.mxu0 %v3373_v1  ;;  %1067 = vmatprep.mubr.bf16.mxu1 %v3374_v2 }
 0x27b   :  { %v1440_v54 = vmul.f32 0.0078125, %v1423_v29 }
 0x27c   :  { %1643 = vrot.lane.b32.xlu1 %v4277_v60, %s3563_s3  ;;  %v1665_v20 = vadd.f32 %v1649_v53, %v1601_v52 }
 0x27d   :  { %v3324_v47 = vpop.eup %3323  ;;  %v1456_v40 = vadd.f32 1.1920929e-07, %v1440_v54 }
 0x27e   :  { %v1536_v57 = vpop.xlane.xlu1 %1535  ;;  %v4285_v16 = vmul.f32 %v3324_v47, %v3983_v7  ;;  %v1761_v59 = vmul.f32 0.088388346, %v1665_v20 }
 0x27f   :  { %3329 = vrsqrt.f32 %v1456_v40  ;;  %v1552_v43 = vmul.f32 0.0078125, %v1536_v57  ;;  %v3375_v40 = vld [vmem:[#allocation3 + $0x20] ss:$8 sps:$4 sm:$0xff]   ;;  %v3377_v57 = vld [vmem:[#allocation3 + $0x34] ss:$8 sps:$4 sm:$0xff]  }
 0x280   :  { %1723 = vrot.lane.b32.xlu1 %v4285_v16, %s3563_s3  ;;  %v2851_v54 = vpack.c.bf16 %v1761_v59, %v1761_v59  ;;  %v4308_v59 = vld [vmem:[#allocation9 + $0x8] sm:$0xff] }
 0x281   :  { %v3326_v25 = vpop.eup %3325  ;;  %v1568_v29 = vadd.f32 1.1920929e-07, %v1552_v43  ;;  %1028 = vmatmul.mubr.bf16.gmra.mrb[40].mxu0 %v3375_v40  ;;  %1068 = vmatmul.mubr.bf16.gmra.mrb[40].mxu1 %v3376_v34 }
 0x282   :  { %v2174_v27 = vpop.xlane.xlu1 %2173  ;;  %v4290_v52 = vmul.f32 %v3326_v25, %v3988_v17  ;;  %v3328_v53 = vpop.eup %3327  ;;  %1841 = vst [vmem:[#allocation11] sm:$0xf] %v2851_v54  ;;  %1037 = vmatprep.mubr.bf16.mxu0 %v3377_v57  ;;  %v3378_v17 = vld [vmem:[#allocation3 + $0x74] ss:$8 sps:$4 sm:$0xff]   ;;  %v3380_v54 = vld [vmem:[#allocation3 + $0x70] ss:$8 sps:$4 sm:$0xff]  }
 0x283   :  { %3331 = vrsqrt.f32 %v1568_v29  ;;  %v2191_v7 = vmul.f32 0.0078125, %v2174_v27  ;;  %v4297_v20 = vmul.f32 %v3328_v53, %v3911_v46  ;;  %1077 = vmatprep.mubr.bf16.mxu1 %v3378_v17  ;;  %v1698_v25 = vpop.permute.xlu0 %1697  ;;  %v3379_v29 = vld [vmem:[#allocation3 + $0x30] ss:$8 sps:$4 sm:$0xff]   ;;  %v4310_v27 = vld [vmem:[#allocation8 + $0x8] sm:$0xff] }
 0x284   :  { %4780 = vst [vmem:[#allocation56_spill] sm:$0xff] %v4290_v52  ;;  %2361 = vrot.lane.b32.xlu1 %v4290_v52, %s3563_s3  ;;  %v1729_v34 = vmul.f32 %v1698_v25, %v4274_v9  ;;  %v4329_v25 = vld [vmem:[#allocation9 + $0x10] sm:$0xff] }
 0x285   :  { %v2207_v47 = vadd.f32 1.1920929e-07, %v2191_v7  ;;  %4782 = vst [vmem:[#allocation58_spill] sm:$0xff] %v4297_v20  ;;  %v4785_v7 = vld [vmem:[#allocation34_spill] sm:$0xff] }
 0x286   :  { %v4294_v55 = vpop.xlane.xlu1 %2061 }
 0x287   :  { %4781 = vst [vmem:[#allocation57_spill] sm:$0xff] %v4294_v55  ;;  %3333 = vrsqrt.f32 %v2207_v47 }
 0x288   :  { %2363 = vrot.lane.b32.xlu1 %v4297_v20, %s3563_s3 }
 0x289   :  { %v3330_v1 = vpop.eup %3329  ;;  %1038 = vmatmul.mubr.bf16.gmra.mrb[44].mxu0 %v3379_v29  ;;  %1078 = vmatmul.mubr.bf16.gmra.mrb[44].mxu1 %v3380_v54  ;;  %v4787_v54 = vld [vmem:[#allocation35_spill] sm:$0xff] }
 0x28a   :  { %v4301_v2 = vpop.xlane.xlu1 %2063  ;;  %v4304_v43 = vmul.f32 %v3330_v1, %v3998_v49  ;;  %v1602_v49 = vmul.f32 %v4034_v33, %v4310_v27  ;;  %v1681_v1 = vmul.f32 %v4039_v58, %v4272_v42  ;;  %v1682_v58 = vmul.f32 %v4044_v44, %v4310_v27 }
 0x28b   :  { %4783 = vst [vmem:[#allocation59_spill] sm:$0xff] %v4301_v2 }
 0x28c   :  { %4784 = vst [vmem:[#allocation60_spill] sm:$0xff] %v4304_v43  ;;  %1647 = vrot.lane.b32.xlu1 %v4304_v43, %s3563_s3  ;;  %v1745_v55 = vadd.f32 %v1729_v34, %v1681_v1 }
 0x28d   :  { %v3332_v46 = vpop.eup %3331 }
 0x28e   :  { %v1620_v53 = vpop.permute.xlu1 %1619  ;;  %v4313_v47 = vmul.f32 %v3332_v46, %v4785_v7  ;;  %v1702_v46 = vpop.permute.xlu0 %1701 }
 0x28f   :  { %v1650_v40 = vmul.f32 %v1620_v53, %v4308_v59 }
 0x290   :  { %4786 = vst [vmem:[#allocation34_spill] sm:$0xff] %v4313_v47  ;;  %1727 = vrot.lane.b32.xlu1 %v4313_v47, %s3563_s3 }
 0x291   :  { %v3334_v57 = vpop.eup %3333  ;;  %v1666_v17 = vadd.f32 %v1650_v40, %v1602_v49  ;;  %v4333_v49 = vld [vmem:[#allocation9 + $0x20] sm:$0xff] }
 0x292   :  { %v1700_v29 = vpop.permute.xlu1 %1699  ;;  %v4324_v2 = vmul.f32 %v3334_v57, %v4787_v54  ;;  %v4339_v57 = vld [vmem:[#allocation8 + $0x10] sm:$0xff] }
 0x293   :  { %v1762_v7 = vmul.f32 0.088388346, %v1666_v17  ;;  %v1730_v33 = vmul.f32 %v1700_v29, %v4308_v59  ;;  %v1731_v17 = vmul.f32 %v1702_v46, %v4329_v25  ;;  %v1605_v29 = vmul.f32 %v4078_v37, %v4331_v39 }
 0x294   :  { %4788 = vst [vmem:[#allocation35_spill] sm:$0xff] %v4324_v2  ;;  %2365 = vrot.lane.b32.xlu1 %v4324_v2, %s3563_s3  ;;  %v1603_v46 = vmul.f32 %v4068_v5, %v4339_v57 }
 0x295   :  { %v2852_v53 = vpack.c.bf16 %v1762_v7, %v1762_v7  ;;  %v1626_v34 = vpop.permute.xlu0 %1625  ;;  %v1746_v1 = vadd.f32 %v1730_v33, %v1682_v58  ;;  %v1683_v7 = vmul.f32 %v4058_v45, %v4339_v57  ;;  %v4352_v33 = vld [vmem:[#allocation8 + $0x18] sm:$0xff] }
 0x296   :  { %1857 = vxpose.xlu0.b32.start [1/16] %v1745_v55, 128  ;;  %v4337_v40 = vpop.permute.xlu1 %2337  ;;  %v1653_v54 = vmul.f32 %v1626_v34, %v4333_v49  ;;  %v4354_v58 = vld [vmem:[#allocation9 + $0x18] sm:$0xff]  ;;  %v4356_v34 = vld [vmem:[#allocation8 + $0x30] sm:$0xff] }
 0x297   :  { %1842 = vst [vmem:[#allocation11 + $0x8] sm:$0xf] %v2852_v53  ;;  %v1747_v55 = vadd.f32 %v1731_v17, %v1683_v7 }
 0x298   :  { %v1669_v38 = vadd.f32 %v1653_v54, %v1605_v29  ;;  %v1604_v29 = vmul.f32 %v4073_v13, %v4352_v33 }
 0x299   :  { %v1706_v2 = vpop.permute.xlu0 %1705 }
 0x29a   :  { %1858 = vxpose.xlu0.b32.cont [2/16] %v1746_v1, 128  ;;  %v4347_v44 = vpop.permute.xlu1 %2339  ;;  %v1765_v51 = vmul.f32 0.088388346, %v1669_v38  ;;  %v4358_v1 = vld [vmem:[#allocation9 + $0x30] sm:$0xff]  ;;  %v1733_v13 = vmul.f32 %v1706_v2, %v4333_v49 }
 0x29c   :  { %v2855_v24 = vpack.c.bf16 %v1765_v51, %v1765_v51 }
 0x29e   :  { %1859 = vxpose.xlu0.b32.cont [3/16] %v1747_v55, 128  ;;  %v1622_v53 = vpop.permute.xlu1 %1621  ;;  %1845 = vst [vmem:[#allocation11 + $0x20] sm:$0xf] %v2855_v24  ;;  %v1607_v24 = vmul.f32 %v4107_v12, %v4356_v34 }
 0x29f   :  { %v1651_v37 = vmul.f32 %v1622_v53, %v4329_v25 }
 0x2a1   :  { %v1667_v45 = vadd.f32 %v1651_v37, %v1603_v46  ;;  %v1630_v17 = vpop.permute.xlu0 %1629 }
 0x2a2   :  { %v1624_v38 = vpop.permute.xlu1 %1623  ;;  %v1655_v54 = vmul.f32 %v1630_v17, %v4358_v1 }
 0x2a3   :  { %v1763_v51 = vmul.f32 0.088388346, %v1667_v45  ;;  %v1652_v5 = vmul.f32 %v1624_v38, %v4354_v58  ;;  %v1684_v45 = vmul.f32 %v4081_v56, %v4352_v33  ;;  %v4374_v56 = vld [vmem:[#allocation9 + $0x40] sm:$0xff] }
 0x2a4   :  { %v1671_v53 = vadd.f32 %v1655_v54, %v1607_v24 }
 0x2a5   :  { %v2853_v7 = vpack.c.bf16 %v1763_v51, %v1763_v51  ;;  %v1668_v55 = vadd.f32 %v1652_v5, %v1604_v29  ;;  %v1685_v51 = vmul.f32 %v4090_v35, %v4331_v39  ;;  %v1710_v17 = vpop.permute.xlu0 %1709  ;;  %v4372_v5 = vld [vmem:[#allocation8 + $0x40] sm:$0xff]  ;;  %v4381_v35 = vld [vmem:[#allocation9 + $0x28] sm:$0xff] }
 0x2a6   :  { %v1704_v46 = vpop.permute.xlu1 %1703  ;;  %v1767_v43 = vmul.f32 0.088388346, %v1671_v53  ;;  %v1609_v2 = vmul.f32 %v4140_v22, %v4372_v5  ;;  %v2369_v22 = vmul.f32 %v4337_v40, %v4274_v9  ;;  %v1687_v9 = vmul.f32 %v4119_v62, %v4356_v34 }
 0x2a7   :  { %1843 = vst [vmem:[#allocation11 + $0x10] sm:$0xf] %v2853_v7  ;;  %v1764_v37 = vmul.f32 0.088388346, %v1668_v55  ;;  %v1732_v47 = vmul.f32 %v1704_v46, %v4354_v58  ;;  %v1749_v29 = vadd.f32 %v1733_v13, %v1685_v51 }
 0x2a8   :  { %v2857_v52 = vpack.c.bf16 %v1767_v43, %v1767_v43 }
 0x2a9   :  { %v2854_v38 = vpack.c.bf16 %v1764_v37, %v1764_v37  ;;  %v1748_v20 = vadd.f32 %v1732_v47, %v1684_v45  ;;  %v4379_v47 = vld [vmem:[#allocation8 + $0x28] sm:$0xff] }
 0x2aa   :  { %v2342_v12 = vpop.permute.xlu1 %2341  ;;  %1847 = vst [vmem:[#allocation11 + $0x30] sm:$0xf] %v2857_v52  ;;  %v1606_v52 = vmul.f32 %v4110_v50, %v4379_v47  ;;  %v1735_v50 = vmul.f32 %v1710_v17, %v4358_v1 }
 0x2ab   :  { %1844 = vst [vmem:[#allocation11 + $0x18] sm:$0xf] %v2854_v38  ;;  %1860 = vxpose.xlu0.b32.cont [4/16] %v1748_v20, 128  ;;  %v1686_v38 = vmul.f32 %v4122_v28, %v4379_v47  ;;  %v2322_v28 = vmul.f32 %v4063_v31, %v4310_v27  ;;  %v2371_v17 = vmul.f32 %v2342_v12, %v4329_v25 }
 0x2ac   :  { %v1751_v40 = vadd.f32 %v1735_v50, %v1687_v9  ;;  %v2324_v25 = vmul.f32 %v4102_v36, %v4352_v33  ;;  %v4426_v9 = vld [vmem:[#allocation8 + $0x50] sm:$0xff] }
 0x2ad   :  { %v1634_v54 = vpop.permute.xlu0 %1633 }
 0x2ae   :  { %v2344_v24 = vpop.permute.xlu1 %2343  ;;  %v1657_v43 = vmul.f32 %v1634_v54, %v4374_v56 }
 0x2af   :  { %1861 = vxpose.xlu0.b32.cont [5/16] %v1749_v29, 128  ;;  %v2321_v29 = vmul.f32 %v4051_v11, %v4272_v42 }
 0x2b0   :  { %v1673_v7 = vadd.f32 %v1657_v43, %v1609_v2 }
 0x2b2   :  { %v1628_v20 = vpop.permute.xlu1 %1627  ;;  %v1769_v53 = vmul.f32 0.088388346, %v1673_v7  ;;  %v2385_v7 = vadd.f32 %v2369_v22, %v2321_v29  ;;  %v4789_v29 = vld [vmem:[#allocation47_spill] sm:$0xff] }
 0x2b3   :  { %v1654_v55 = vmul.f32 %v1628_v20, %v4381_v35  ;;  %v2370_v20 = vmul.f32 %v4347_v44, %v4308_v59  ;;  %v2323_v59 = vmul.f32 %v4093_v15, %v4339_v57  ;;  %v4405_v44 = vld [vmem:[#allocation8 + $0x38] sm:$0xff]  ;;  %v1689_v50 = vmul.f32 %v4789_v29, %v4372_v5 }
 0x2b4   :  { %v2859_v37 = vpack.c.bf16 %v1769_v53, %v1769_v53  ;;  %v2372_v53 = vmul.f32 %v2344_v24, %v4354_v58  ;;  %v1608_v31 = vmul.f32 %v4157_v30, %v4405_v44  ;;  %v1688_v15 = vmul.f32 %v4164_v19, %v4405_v44 }
 0x2b5   :  { %v1670_v46 = vadd.f32 %v1654_v55, %v1606_v52  ;;  %v2386_v42 = vadd.f32 %v2370_v20, %v2322_v28  ;;  %v4401_v52 = vld [vmem:[#allocation9 + $0x38] sm:$0xff]  ;;  %v2387_v55 = vadd.f32 %v2371_v17, %v2323_v59  ;;  %v4428_v28 = vld [vmem:[#allocation9 + $0x50] sm:$0xff]  ;;  %v1611_v17 = vmul.f32 %v4211_v63, %v4426_v9 }
 0x2b6   :  { %v1708_v45 = vpop.permute.xlu1 %1707  ;;  %1849 = vst [vmem:[#allocation11 + $0x40] sm:$0xf] %v2859_v37  ;;  %v2388_v37 = vadd.f32 %v2372_v53, %v2324_v25  ;;  %v1691_v29 = vmul.f32 %v4218_v3, %v4426_v9 }
 0x2b7   :  { %v1766_v13 = vmul.f32 0.088388346, %v1670_v46  ;;  %v1734_v51 = vmul.f32 %v1708_v45, %v4381_v35  ;;  %v1714_v46 = vpop.permute.xlu0 %1713 }
 0x2b8   :  { %v1737_v30 = vmul.f32 %v1714_v46, %v4374_v56  ;;  %v4791_v46 = vld [vmem:[#allocation51_spill] sm:$0xff] }
 0x2b9   :  { %v2856_v54 = vpack.c.bf16 %v1766_v13, %v1766_v13  ;;  %v1750_v2 = vadd.f32 %v1734_v51, %v1686_v38  ;;  %v2325_v13 = vmul.f32 %v4131_v18, %v4331_v39 }
 0x2ba   :  { %v2346_v43 = vpop.permute.xlu1 %2345 }
 0x2bb   :  { %1846 = vst [vmem:[#allocation11 + $0x28] sm:$0xf] %v2856_v54  ;;  %1862 = vxpose.xlu0.b32.cont [6/16] %v1750_v2, 128  ;;  %v2373_v45 = vmul.f32 %v2346_v43, %v4333_v49  ;;  %v1753_v49 = vadd.f32 %v1737_v30, %v1689_v50  ;;  %v4790_v2 = vld [vmem:[#allocation45_spill] sm:$0xff]  ;;  %v4451_v30 = vld [vmem:[#allocation8 + $0x60] sm:$0xff] }
 0x2bc   :  { %v2326_v43 = vmul.f32 %v4790_v2, %v4379_v47 }
 0x2bd   :  { %2497 = vxpose.xlu1.b32.start [1/16] %v2385_v7, 128  ;;  %v2389_v19 = vadd.f32 %v2373_v45, %v2325_v13 }
 0x2be   :  { %v2348_v11 = vpop.permute.xlu1 %2347 }
 0x2bf   :  { %1863 = vxpose.xlu0.b32.cont [7/16] %v1751_v40, 128  ;;  %v2374_v54 = vmul.f32 %v2348_v11, %v4381_v35  ;;  %v4430_v40 = vld [vmem:[#allocation9 + $0x48] sm:$0xff]  ;;  %v2327_v11 = vmul.f32 %v4170_v48, %v4356_v34  ;;  %v2328_v48 = vmul.f32 %v4178_v4, %v4405_v44  ;;  %v4453_v4 = vld [vmem:[#allocation9 + $0x60] sm:$0xff] }
 0x2c1   :  { %2498 = vxpose.xlu1.b32.cont [2/16] %v2386_v42, 128  ;;  %v2390_v18 = vadd.f32 %v2374_v54, %v2326_v43  ;;  %v4434_v42 = vld [vmem:[#allocation8 + $0x48] sm:$0xff]  ;;  %v4462_v43 = vld [vmem:[#allocation9 + $0x58] sm:$0xff] }
 0x2c2   :  { %v1632_v62 = vpop.permute.xlu1 %1631  ;;  %v2330_v3 = vmul.f32 %v4203_v6, %v4434_v42 }
 0x2c3   :  { %v1656_v27 = vmul.f32 %v1632_v62, %v4401_v52 }
 0x2c5   :  { %v1672_v12 = vadd.f32 %v1656_v27, %v1608_v31  ;;  %2499 = vxpose.xlu1.b32.cont [3/16] %v2387_v55, 128 }
 0x2c6   :  { %v1712_v57 = vpop.permute.xlu1 %1711 }
 0x2c7   :  { %v1768_v22 = vmul.f32 0.088388346, %v1672_v12  ;;  %v1736_v24 = vmul.f32 %v1712_v57, %v4401_v52 }
 0x2c9   :  { %v2858_v38 = vpack.c.bf16 %v1768_v22, %v1768_v22  ;;  %v1752_v36 = vadd.f32 %v1736_v24, %v1688_v15  ;;  %2500 = vxpose.xlu1.b32.cont [4/16] %v2388_v37, 128  ;;  %v2329_v24 = vmul.f32 %v4200_v14, %v4372_v5  ;;  %v1613_v14 = vmul.f32 %v4225_v21, %v4451_v30 }
 0x2ca   :  { %v2350_v51 = vpop.permute.xlu1 %2349 }
 0x2cb   :  { %1848 = vst [vmem:[#allocation11 + $0x38] sm:$0xf] %v2858_v38  ;;  %1864 = vxpose.xlu0.b32.cont [8/16] %v1752_v36, 128  ;;  %v2375_v39 = vmul.f32 %v2350_v51, %v4358_v1  ;;  %v1610_v1 = vmul.f32 %v4190_v10, %v4434_v42  ;;  %v1690_v10 = vmul.f32 %v4791_v46, %v4434_v42 }
 0x2cd   :  { %2501 = vxpose.xlu1.b32.cont [5/16] %v2389_v19, 128  ;;  %v2391_v55 = vadd.f32 %v2375_v39, %v2327_v11  ;;  %v4466_v39 = vld [vmem:[#allocation8 + $0x58] sm:$0xff] }
 0x2ce   :  { %v2354_v7 = vpop.permute.xlu0 %2353  ;;  %v2352_v20 = vpop.permute.xlu1 %2351  ;;  %v1612_v21 = vmul.f32 %v4228_v61, %v4466_v39  ;;  %v1692_v61 = vmul.f32 %v4238_v23, %v4466_v39 }
 0x2cf   :  { %1865 = vxpose.xlu0.b32.cont [9/16] %v1753_v49, 128  ;;  %v2376_v53 = vmul.f32 %v2352_v20, %v4401_v52  ;;  %v2377_v63 = vmul.f32 %v2354_v7, %v4374_v56 }
 0x2d1   :  { %2502 = vxpose.xlu1.b32.cont [6/16] %v2390_v18, 128  ;;  %v2392_v57 = vadd.f32 %v2376_v53, %v2328_v48  ;;  %v2393_v54 = vadd.f32 %v2377_v63, %v2329_v24 }
 0x2d2   :  { %v1638_v59 = vpop.permute.xlu0 %1637  ;;  %v1636_v62 = vpop.permute.xlu1 %1635 }
 0x2d3   :  { %v1659_v31 = vmul.f32 %v1638_v59, %v4428_v28  ;;  %v1658_v27 = vmul.f32 %v1636_v62, %v4430_v40  ;;  %v4471_v62 = vld [vmem:[#allocation8 + $0x70] sm:$0xff] }
 0x2d4   :  { %v1615_v6 = vmul.f32 %v4245_v32, %v4471_v62  ;;  %v1693_v32 = vmul.f32 %v4235_v41, %v4451_v30  ;;  %v4490_v41 = vld [vmem:[#allocation9 + $0x68] sm:$0xff] }
 0x2d5   :  { %v1675_v34 = vadd.f32 %v1659_v31, %v1611_v17  ;;  %v1674_v25 = vadd.f32 %v1658_v27, %v1610_v1  ;;  %2503 = vxpose.xlu1.b32.cont [7/16] %v2391_v55, 128  ;;  %v4473_v55 = vld [vmem:[#allocation9 + $0x70] sm:$0xff] }
 0x2d6   :  { %v1718_v12 = vpop.permute.xlu0 %1717  ;;  %v1716_v15 = vpop.permute.xlu1 %1715 }
 0x2d7   :  { %v1771_v37 = vmul.f32 0.088388346, %v1675_v34  ;;  %v1770_v45 = vmul.f32 0.088388346, %v1674_v25  ;;  %v1738_v22 = vmul.f32 %v1716_v15, %v4430_v40  ;;  %v1739_v36 = vmul.f32 %v1718_v12, %v4428_v28 }
 0x2d9   :  { %v2861_v13 = vpack.c.bf16 %v1771_v37, %v1771_v37  ;;  %v2860_v38 = vpack.c.bf16 %v1770_v45, %v1770_v45  ;;  %v1754_v51 = vadd.f32 %v1738_v22, %v1690_v10  ;;  %2504 = vxpose.xlu1.b32.cont [8/16] %v2392_v57, 128  ;;  %v1755_v7 = vadd.f32 %v1739_v36, %v1691_v29 }
 0x2da   :  { %v1642_v50 = vpop.permute.xlu0 %1641  ;;  %v2356_v19 = vpop.permute.xlu1 %2355  ;;  %v2331_v45 = vmul.f32 %v4248_v0, %v4426_v9  ;;  %v2332_v36 = vmul.f32 %v4259_v26, %v4466_v39 }
 0x2db   :  { %1851 = vst [vmem:[#allocation11 + $0x50] sm:$0xf] %v2861_v13  ;;  %1850 = vst [vmem:[#allocation11 + $0x48] sm:$0xf] %v2860_v38  ;;  %v1661_v49 = vmul.f32 %v1642_v50, %v4453_v4  ;;  %v2378_v2 = vmul.f32 %v2356_v19, %v4430_v40  ;;  %1866 = vxpose.xlu0.b32.cont [10/16] %v1754_v51, 128  ;;  %v4492_v50 = vld [vmem:[#allocation8 + $0x68] sm:$0xff] }
 0x2dc   :  { %v1614_v19 = vmul.f32 %v4277_v60, %v4492_v50  ;;  %v1695_v60 = vmul.f32 %v4256_v8, %v4471_v62  ;;  %v4511_v8 = vld [vmem:[#allocation9 + $0x78] sm:$0xff] }
 0x2dd   :  { %v1677_v20 = vadd.f32 %v1661_v49, %v1613_v14  ;;  %2505 = vxpose.xlu1.b32.cont [9/16] %v2393_v54, 128  ;;  %v2394_v59 = vadd.f32 %v2378_v2, %v2330_v3 }
 0x2de   :  { %v1722_v18 = vpop.permute.xlu0 %1721  ;;  %v1640_v11 = vpop.permute.xlu1 %1639 }
 0x2df   :  { %v1773_v17 = vmul.f32 0.088388346, %v1677_v20  ;;  %v1660_v1 = vmul.f32 %v1640_v11, %v4462_v43  ;;  %1867 = vxpose.xlu0.b32.cont [11/16] %v1755_v7, 128  ;;  %v1741_v12 = vmul.f32 %v1722_v18, %v4453_v4  ;;  %v1694_v7 = vmul.f32 %v4285_v16, %v4492_v50 }
 0x2e1   :  { %v2863_v53 = vpack.c.bf16 %v1773_v17, %v1773_v17  ;;  %v1676_v31 = vadd.f32 %v1660_v1, %v1612_v21  ;;  %2506 = vxpose.xlu1.b32.cont [10/16] %v2394_v59, 128  ;;  %v1757_v23 = vadd.f32 %v1741_v12, %v1693_v32  ;;  %v4792_v59 = vld [vmem:[#allocation56_spill] sm:$0xff]  ;;  %v4795_v32 = vld [vmem:[#allocation34_spill] sm:$0xff] }
 0x2e2   :  { %v1646_v27 = vpop.permute.xlu0 %1645  ;;  %v1720_v48 = vpop.permute.xlu1 %1719  ;;  %v2333_v21 = vmul.f32 %v4792_v59, %v4451_v30 }
 0x2e3   :  { %1853 = vst [vmem:[#allocation11 + $0x60] sm:$0xf] %v2863_v53  ;;  %v1772_v34 = vmul.f32 0.088388346, %v1676_v31  ;;  %v1663_v25 = vmul.f32 %v1646_v27, %v4473_v55  ;;  %v1740_v63 = vmul.f32 %v1720_v48, %v4462_v43 }
 0x2e5   :  { %v2862_v46 = vpack.c.bf16 %v1772_v34, %v1772_v34  ;;  %v1679_v10 = vadd.f32 %v1663_v25, %v1615_v6  ;;  %v1756_v15 = vadd.f32 %v1740_v63, %v1692_v61  ;;  %v4793_v6 = vld [vmem:[#allocation58_spill] sm:$0xff]  ;;  %v4509_v25 = vld [vmem:[#allocation8 + $0x78] sm:$0xff]  ;;  %v4794_v63 = vld [vmem:[#allocation60_spill] sm:$0xff] }
 0x2e6   :  { %v2358_v57 = vpop.permute.xlu1 %2357  ;;  %v1726_v49 = vpop.permute.xlu0 %1725  ;;  %v2334_v27 = vmul.f32 %v4793_v6, %v4492_v50  ;;  %v1616_v12 = vmul.f32 %v4794_v63, %v4509_v25  ;;  %v4803_v6 = vld [vmem:[#allocation43_spill] sm:$0xff] }
 0x2e7   :  { %1852 = vst [vmem:[#allocation11 + $0x58] sm:$0xf] %v2862_v46  ;;  %v1775_v37 = vmul.f32 0.088388346, %v1679_v10  ;;  %v2379_v22 = vmul.f32 %v2358_v57, %v4428_v28  ;;  %1868 = vxpose.xlu0.b32.cont [12/16] %v1756_v15, 128  ;;  %v1743_v3 = vmul.f32 %v1726_v49, %v4473_v55  ;;  %v4798_v49 = vld [vmem:[#allocation38_spill] sm:$0xff] }
 0x2e9   :  { %v2865_v24 = vpack.c.bf16 %v1775_v37, %v1775_v37  ;;  %v2395_v13 = vadd.f32 %v2379_v22, %v2331_v45  ;;  %v1759_v53 = vadd.f32 %v1743_v3, %v1695_v60  ;;  %v1696_v37 = vmul.f32 %v4795_v32, %v4509_v25  ;;  %v4801_v60 = vld [vmem:[#allocation41_spill] sm:$0xff] }
 0x2ea   :  { %v2360_v38 = vpop.permute.xlu1 %2359  ;;  %v2068_v59 = vmul.f32 0.0078125, %v4801_v60 }
 0x2eb   :  { %1855 = vst [vmem:[#allocation11 + $0x70] sm:$0xf] %v2865_v24  ;;  %v2380_v51 = vmul.f32 %v2360_v38, %v4462_v43  ;;  %1869 = vxpose.xlu0.b32.cont [13/16] %v1757_v23, 128  ;;  %2507 = vxpose.xlu1.b32.cont [11/16] %v2395_v13, 128  ;;  %v2368_v24 = vpop.permute.xlu0 %2367  ;;  %v4796_v38 = vld [vmem:[#allocation35_spill] sm:$0xff] }
 0x2ed   :  { %v2396_v29 = vadd.f32 %v2380_v51, %v2332_v36  ;;  %v2335_v36 = vmul.f32 %v4796_v38, %v4471_v62  ;;  %v4809_v38 = vld [vmem:[#allocation48_spill] sm:$0xff] }
 0x2ee   :  { %v1644_v0 = vpop.permute.xlu1 %1643 }
 0x2ef   :  { %v1662_v54 = vmul.f32 %v1644_v0, %v4490_v41  ;;  %2508 = vxpose.xlu1.b32.cont [12/16] %v2396_v29, 128  ;;  %v2384_v29 = vmul.f32 %v2368_v24, %v4511_v8 }
 0x2f1   :  { %v1678_v14 = vadd.f32 %v1662_v54, %v1614_v19  ;;  %v4797_v19 = vld [vmem:[#allocation55_spill] sm:$0xff] }
 0x2f2   :  { %v1724_v2 = vpop.permute.xlu1 %1723  ;;  %v2336_v54 = vmul.f32 %v4797_v19, %v4509_v25 }
 0x2f3   :  { %v1774_v26 = vmul.f32 0.088388346, %v1678_v14  ;;  %v1742_v20 = vmul.f32 %v1724_v2, %v4490_v41  ;;  %v2065_v2 = vmul.f32 0.0078125, %v4798_v49  ;;  %v4812_v49 = vld [vmem:[#allocation24_spill] sm:$0xff] }
 0x2f4   :  { %v2400_v14 = vadd.f32 %v2384_v29, %v2336_v54  ;;  %v4811_v54 = vld [vmem:[#allocation50_spill] sm:$0xff] }
 0x2f5   :  { %v2864_v18 = vpack.c.bf16 %v1774_v26, %v1774_v26  ;;  %v1758_v11 = vadd.f32 %v1742_v20, %v1694_v7  ;;  %v2081_v26 = vadd.f32 1.1920929e-07, %v2065_v2  ;;  %v4799_v7 = vld [vmem:[#allocation39_spill] sm:$0xff] }
 0x2f6   :  { %v2362_v17 = vpop.permute.xlu1 %2361  ;;  %v2066_v20 = vmul.f32 0.0078125, %v4799_v7 }
 0x2f7   :  { %1854 = vst [vmem:[#allocation11 + $0x68] sm:$0xf] %v2864_v18  ;;  %v2381_v1 = vmul.f32 %v2362_v17, %v4453_v4  ;;  %1870 = vxpose.xlu0.b32.cont [14/16] %v1758_v11, 128  ;;  %3335 = vrsqrt.f32 %v2081_v26  ;;  %v4800_v18 = vld [vmem:[#allocation40_spill] sm:$0xff] }
 0x2f8   :  { %v2082_v3 = vadd.f32 1.1920929e-07, %v2066_v20  ;;  %v2067_v11 = vmul.f32 0.0078125, %v4800_v18  ;;  %v4813_v20 = vld [vmem:[#allocation52_spill] sm:$0xff]  ;;  %v4814_v18 = vld [vmem:[#allocation25_spill] sm:$0xff] }
 0x2f9   :  { %v2397_v31 = vadd.f32 %v2381_v1, %v2333_v21  ;;  %v2084_v21 = vadd.f32 1.1920929e-07, %v2068_v59  ;;  %v4802_v1 = vld [vmem:[#allocation42_spill] sm:$0xff]  ;;  %v4815_v59 = vld [vmem:[#allocation53_spill] sm:$0xff] }
 0x2fa   :  { %v2364_v16 = vpop.permute.xlu1 %2363  ;;  %3337 = vrsqrt.f32 %v2082_v3  ;;  %v2083_v17 = vadd.f32 1.1920929e-07, %v2067_v11  ;;  %v2075_v3 = vmul.f32 0.0078125, %v4813_v20 }
 0x2fb   :  { %v2382_v48 = vmul.f32 %v2364_v16, %v4490_v41  ;;  %1871 = vxpose.xlu0.b32.cont [15/16] %v1759_v53, 128  ;;  %2509 = vxpose.xlu1.b32.cont [13/16] %v2397_v31, 128  ;;  %v2069_v53 = vmul.f32 0.0078125, %v4802_v1  ;;  %v4816_v1 = vld [vmem:[#allocation26_spill] sm:$0xff] }
 0x2fc   :  { %3339 = vrsqrt.f32 %v2083_v17  ;;  %v2091_v60 = vadd.f32 1.1920929e-07, %v2075_v3 }
 0x2fd   :  { %v2398_v34 = vadd.f32 %v2382_v48, %v2334_v27  ;;  %3341 = vrsqrt.f32 %v2084_v21  ;;  %v2085_v16 = vadd.f32 1.1920929e-07, %v2069_v53  ;;  %v2070_v27 = vmul.f32 0.0078125, %v4803_v6  ;;  %v4804_v48 = vld [vmem:[#allocation20_spill] sm:$0xff] }
 0x2fe   :  { %v1648_v61 = vpop.permute.xlu1 %1647  ;;  %v2076_v21 = vmul.f32 0.0078125, %v4815_v59 }
 0x2ff   :  { %v1664_v46 = vmul.f32 %v1648_v61, %v4511_v8  ;;  %2510 = vxpose.xlu1.b32.cont [14/16] %v2398_v34, 128  ;;  %3343 = vrsqrt.f32 %v2085_v16  ;;  %v2086_v63 = vadd.f32 1.1920929e-07, %v2070_v27  ;;  %v4817_v27 = vld [vmem:[#allocation49_spill] sm:$0xff] }
 0x301   :  { %v1680_v10 = vadd.f32 %v1664_v46, %v1616_v12  ;;  %v3336_v31 = vpop.eup %3335  ;;  %v4805_v12 = vld [vmem:[#allocation44_spill] sm:$0xff]  ;;  %3345 = vrsqrt.f32 %v2086_v63 }
 0x302   :  { %v1728_v15 = vpop.permute.xlu1 %1727  ;;  %v4532_v34 = vmul.f32 %v3336_v31, %v4804_v48  ;;  %v2071_v46 = vmul.f32 0.0078125, %v4805_v12  ;;  %v2077_v48 = vmul.f32 0.0078125, %v4817_v27 }
 0x303   :  { %v1776_v57 = vmul.f32 0.088388346, %v1680_v10  ;;  %v1744_v45 = vmul.f32 %v1728_v15, %v4511_v8  ;;  %v4806_v10 = vld [vmem:[#allocation21_spill] sm:$0xff] }
 0x304   :  { %v3338_v61 = vpop.eup %3337  ;;  %v2087_v32 = vadd.f32 1.1920929e-07, %v2071_v46  ;;  %v4818_v46 = vld [vmem:[#allocation27_spill] sm:$0xff] }
 0x305   :  { %v2866_v22 = vpack.c.bf16 %v1776_v57, %v1776_v57  ;;  %v1760_v23 = vadd.f32 %v1744_v45, %v1696_v37  ;;  %v4538_v15 = vmul.f32 %v3338_v61, %v4806_v10  ;;  %v4807_v37 = vld [vmem:[#allocation46_spill] sm:$0xff]  ;;  %v2092_v61 = vadd.f32 1.1920929e-07, %v2076_v21 }
 0x306   :  { %v2366_v13 = vpop.permute.xlu1 %2365  ;;  %v3340_v57 = vpop.eup %3339  ;;  %v2072_v45 = vmul.f32 0.0078125, %v4807_v37  ;;  %3347 = vrsqrt.f32 %v2087_v32 }
 0x307   :  { %1856 = vst [vmem:[#allocation11 + $0x78] sm:$0xf] %v2866_v22  ;;  %v2383_v51 = vmul.f32 %v2366_v13, %v4473_v55  ;;  %1872 = vxpose.xlu0.b32.end [16/16] %v1760_v23, 128  ;;  %v4808_v22 = vld [vmem:[#allocation22_spill] sm:$0xff]  ;;  %v3342_v24 = vpop.eup %3341 }
 0x308   :  { %v4544_v23 = vmul.f32 %v3340_v57, %v4808_v22  ;;  %v2088_v13 = vadd.f32 1.1920929e-07, %v2072_v45 }
 0x309   :  { %v2399_v0 = vadd.f32 %v2383_v51, %v2335_v36  ;;  %v2073_v36 = vmul.f32 0.0078125, %v4809_v38  ;;  %v4810_v51 = vld [vmem:[#allocation23_spill] sm:$0xff]  ;;  %v4819_v38 = vld [vmem:[#allocation54_spill] sm:$0xff] }
 0x30a   :  { %v4550_v29 = vmul.f32 %v3342_v24, %v4810_v51  ;;  %3349 = vrsqrt.f32 %v2088_v13 }
 0x30b   :  { %2511 = vxpose.xlu1.b32.cont [15/16] %v2399_v0, 128  ;;  %v3344_v0 = vpop.eup %3343  ;;  %v2089_v19 = vadd.f32 1.1920929e-07, %v2073_v36  ;;  %v2078_v36 = vmul.f32 0.0078125, %v4819_v38  ;;  %v4824_v38 = vld [vmem:[#allocation31_spill] sm:$0xff] }
 0x30c   :  { %v4556_v2 = vmul.f32 %v3344_v0, %v4812_v49  ;;  %v3346_v26 = vpop.eup %3345 }
 0x30d   :  { %3351 = vrsqrt.f32 %v2089_v19  ;;  %v4562_v11 = vmul.f32 %v3346_v26, %v4814_v18  ;;  %v2093_v19 = vadd.f32 1.1920929e-07, %v2077_v48  ;;  %v2094_v20 = vadd.f32 1.1920929e-07, %v2078_v36 }
 0x30f   :  { %2512 = vxpose.xlu1.b32.end [16/16] %v2400_v14, 128  ;;  %v2074_v14 = vmul.f32 0.0078125, %v4811_v54 }
 0x310   :  { %v3348_v17 = vpop.eup %3347 }
 0x311   :  { %v2090_v7 = vadd.f32 1.1920929e-07, %v2074_v14  ;;  %v4568_v53 = vmul.f32 %v3348_v17, %v4816_v1  ;;  %v4820_v14 = vld [vmem:[#allocation29_spill] sm:$0xff] }
 0x313   :  { %3353 = vrsqrt.f32 %v2090_v7 }
 0x314   :  { %v3350_v31 = vpop.eup %3349  ;;  %3355 = vrsqrt.f32 %v2091_v60  ;;  %v4821_v60 = vld [vmem:[#allocation57_spill] sm:$0xff] }
 0x315   :  { %v4574_v10 = vmul.f32 %v3350_v31, %v4818_v46  ;;  %3357 = vrsqrt.f32 %v2092_v61  ;;  %v2079_v59 = vmul.f32 0.0078125, %v4821_v60  ;;  %v4822_v31 = vld [vmem:[#allocation30_spill] sm:$0xff] }
 0x316   :  { %3359 = vrsqrt.f32 %v2093_v19 }
 0x317   :  { %v3352_v37 = vpop.eup %3351  ;;  %3361 = vrsqrt.f32 %v2094_v20 }
 0x318   :  { %v4580_v49 = vmul.f32 %v3352_v37, %v4820_v14  ;;  %v2095_v37 = vadd.f32 1.1920929e-07, %v2079_v59 }
 0x31a   :  { %3363 = vrsqrt.f32 %v2095_v37 }
 0x31d   :  { %v3354_v26 = vpop.eup %3353 }
 0x31e   :  { %v3356_v48 = vpop.eup %3355 }
 0x31f   :  { %v4592_v36 = vmul.f32 %v3356_v48, %v4824_v38 }
 0x330   :  { %2257 = vrot.lane.b32.xlu0 %v4532_v34, %s3563_s3 }
 0x334   :  { %2259 = vrot.lane.b32.xlu0 %v4538_v15, %s3563_s3 }
 0x338   :  { %2261 = vrot.lane.b32.xlu0 %v4544_v23, %s3563_s3 }
 0x33c   :  { %2263 = vrot.lane.b32.xlu0 %v4550_v29, %s3563_s3 }
 0x340   :  { %2265 = vrot.lane.b32.xlu0 %v4556_v2, %s3563_s3 }
 0x344   :  { %2267 = vrot.lane.b32.xlu0 %v4562_v11, %s3563_s3  ;;  %v1049_v16 = vpop.f32.mrb[32].mxu1  ;;  %v1009_v6 = vpop.f32.mrb[32].mxu0 }
 0x345   :  { %v1051_v63 = vpop.f32.mrb[33].mxu1  ;;  %v1011_v12 = vpop.f32.mrb[33].mxu0 }
 0x346   :  { %v1013_v57 = vpop.f32.mrb[34].mxu0  ;;  %v1053_v32 = vpop.f32.mrb[34].mxu1  ;;  %v3018_v22 = vpack.c.bf16 %v1051_v63, %v1049_v16  ;;  %v3010_v24 = vpack.c.bf16 %v1011_v12, %v1009_v6  ;;  %v4586_v16 = vmul.f32 %v3354_v26, %v4822_v31 }
 0x347   :  { %v1015_v13 = vpop.f32.mrb[35].mxu0  ;;  %v1055_v0 = vpop.f32.mrb[35].mxu1 }
 0x348   :  { %2269 = vrot.lane.b32.xlu0 %v4568_v53, %s3563_s3  ;;  %v3011_v51 = vpack.c.bf16 %v1015_v13, %v1013_v57  ;;  %1288 = vst [vmem:[#allocation14 + $0x40] sm:$0xff] %v3018_v22  ;;  %1280 = vst [vmem:[#allocation14] sm:$0xff] %v3010_v24  ;;  %v3019_v54 = vpack.c.bf16 %v1055_v0, %v1053_v32 }
 0x34a   :  { %1281 = vst [vmem:[#allocation14 + $0x8] sm:$0xff] %v3011_v51  ;;  %1289 = vst [vmem:[#allocation14 + $0x48] sm:$0xff] %v3019_v54  ;;  %v3358_v51 = vpop.eup %3357 }
 0x34b   :  { %v1873_v45 = vpop.trf.xlu0 }
 0x34c   :  { %2271 = vrot.lane.b32.xlu0 %v4574_v10, %s3563_s3  ;;  %v1059_v18 = vpop.f32.mrb[36].mxu1  ;;  %v1019_v17 = vpop.f32.mrb[36].mxu0 }
 0x34d   :  { %v1061_v21 = vpop.f32.mrb[37].mxu1  ;;  %v1021_v1 = vpop.f32.mrb[37].mxu0 }
 0x34e   :  { %v1023_v6 = vpop.f32.mrb[38].mxu0  ;;  %v1063_v27 = vpop.f32.mrb[38].mxu1  ;;  %v3020_v12 = vpack.c.bf16 %v1061_v21, %v1059_v18  ;;  %v3012_v46 = vpack.c.bf16 %v1021_v1, %v1019_v17  ;;  %v4825_v17 = vld [vmem:[#allocation32_spill] sm:$0xff] }
 0x34f   :  { %v1874_v7 = vpop.trf.xlu0  ;;  %v1025_v57 = vpop.f32.mrb[39].mxu0  ;;  %v4597_v60 = vmul.f32 %v3358_v51, %v4825_v17 }
 0x350   :  { %2273 = vrot.lane.b32.xlu0 %v4580_v49, %s3563_s3  ;;  %v2918_v3 = vpack.c.bf16 %v1874_v7, %v1873_v45  ;;  %v1065_v32 = vpop.f32.mrb[39].mxu1  ;;  %v4823_v45 = vld [vmem:[#allocation59_spill] sm:$0xff]  ;;  %1290 = vst [vmem:[#allocation14 + $0x50] sm:$0xff] %v3020_v12  ;;  %1282 = vst [vmem:[#allocation14 + $0x10] sm:$0xff] %v3012_v46  ;;  %v3013_v24 = vpack.c.bf16 %v1025_v57, %v1023_v6  ;;  %v3360_v1 = vpop.eup %3359 }
 0x351   :  { %v2080_v22 = vmul.f32 0.0078125, %v4823_v45  ;;  %v3021_v13 = vpack.c.bf16 %v1065_v32, %v1063_v27  ;;  %v3362_v57 = vpop.eup %3361  ;;  %v4826_v32 = vld [vmem:[#allocation28_spill] sm:$0xff] }
 0x352   :  { %2919 = vst [vmem:[#allocation12] sm:$0xff] %v2918_v3   ;;  %1283 = vst [vmem:[#allocation14 + $0x18] sm:$0xff] %v3013_v24  ;;  %v4602_v37 = vmul.f32 %v3360_v1, %v4826_v32  ;;  %v4829_v32 = vld [vmem:[#allocation37_spill] sm:$0xff] }
 0x353   :  { %v1875_v61 = vpop.trf.xlu0  ;;  %v2513_v63 = vpop.trf.xlu1  ;;  %1291 = vst [vmem:[#allocation14 + $0x58] sm:$0xff] %v3021_v13  ;;  %v2096_v20 = vadd.f32 1.1920929e-07, %v2080_v22 }
 0x354   :  { %2275 = vrot.lane.b32.xlu0 %v4586_v16, %s3563_s3  ;;  %v1069_v26 = vpop.f32.mrb[40].mxu1  ;;  %v1029_v7 = vpop.f32.mrb[40].mxu0 }
 0x355   :  { %v1071_v3 = vpop.f32.mrb[41].mxu1  ;;  %v1031_v18 = vpop.f32.mrb[41].mxu0  ;;  %3365 = vrsqrt.f32 %v2096_v20 }
 0x356   :  { %v1033_v59 = vpop.f32.mrb[42].mxu0  ;;  %v1073_v21 = vpop.f32.mrb[42].mxu1  ;;  %v3022_v27 = vpack.c.bf16 %v1071_v3, %v1069_v26  ;;  %v3014_v48 = vpack.c.bf16 %v1031_v18, %v1029_v7 }
 0x357   :  { %v1876_v0 = vpop.trf.xlu0  ;;  %v2514_v19 = vpop.trf.xlu1 }
 0x358   :  { %2277 = vrot.lane.b32.xlu0 %v4592_v36, %s3563_s3  ;;  %v2923_v54 = vpack.c.bf16 %v1876_v0, %v1875_v61  ;;  %v2958_v14 = vpack.c.bf16 %v2514_v19, %v2513_v63  ;;  %v1035_v61 = vpop.f32.mrb[43].mxu0  ;;  %v1075_v63 = vpop.f32.mrb[43].mxu1  ;;  %1292 = vst [vmem:[#allocation14 + $0x60] sm:$0xff] %v3022_v27  ;;  %1284 = vst [vmem:[#allocation14 + $0x20] sm:$0xff] %v3014_v48  ;;  %v4828_v27 = vld [vmem:[#allocation36_spill] sm:$0xff] }
 0x359   :  { %v3015_v12 = vpack.c.bf16 %v1035_v61, %v1033_v59  ;;  %v3023_v46 = vpack.c.bf16 %v1075_v63, %v1073_v21  ;;  %v3364_v20 = vpop.eup %3363 }
 0x35a   :  { %2995 = vst [vmem:[#allocation12 + $0x8] sm:$0xff] %v2923_v54   ;;  %3002 = vst [vmem:[#allocation12 + $0x40] sm:$0xff] %v2958_v14   ;;  %v4827_v54 = vld [vmem:[#allocation33_spill] sm:$0xff]  ;;  %v4612_v48 = vmul.f32 %v3364_v20, %v4828_v27 }
 0x35b   :  { %v1877_v31 = vpop.trf.xlu0  ;;  %v2515_v6 = vpop.trf.xlu1  ;;  %1285 = vst [vmem:[#allocation14 + $0x28] sm:$0xff] %v3015_v12  ;;  %1293 = vst [vmem:[#allocation14 + $0x68] sm:$0xff] %v3023_v46  ;;  %v4607_v14 = vmul.f32 %v3362_v57, %v4827_v54 }
 0x35c   :  { %2279 = vrot.lane.b32.xlu0 %v4597_v60, %s3563_s3  ;;  %v1079_v38 = vpop.f32.mrb[44].mxu1  ;;  %v1039_v51 = vpop.f32.mrb[44].mxu0 }
 0x35d   :  { %v1081_v0 = vpop.f32.mrb[45].mxu1  ;;  %v1041_v19 = vpop.f32.mrb[45].mxu0 }
 0x35e   :  { %v1043_v26 = vpop.f32.mrb[46].mxu0  ;;  %v1083_v7 = vpop.f32.mrb[46].mxu1  ;;  %v3024_v17 = vpack.c.bf16 %v1081_v0, %v1079_v38  ;;  %v3016_v59 = vpack.c.bf16 %v1041_v19, %v1039_v51 }
 0x35f   :  { %v1878_v45 = vpop.trf.xlu0  ;;  %v2516_v22 = vpop.trf.xlu1 }
 0x360   :  { %2281 = vrot.lane.b32.xlu0 %v4602_v37, %s3563_s3  ;;  %v2928_v24 = vpack.c.bf16 %v1878_v45, %v1877_v31  ;;  %v2963_v13 = vpack.c.bf16 %v2516_v22, %v2515_v6  ;;  %v1045_v21 = vpop.f32.mrb[47].mxu0  ;;  %v1085_v1 = vpop.f32.mrb[47].mxu1  ;;  %1294 = vst [vmem:[#allocation14 + $0x70] sm:$0xff] %v3024_v17  ;;  %1286 = vst [vmem:[#allocation14 + $0x30] sm:$0xff] %v3016_v59 }
 0x361   :  { %v3017_v31 = vpack.c.bf16 %v1045_v21, %v1043_v26  ;;  %v3025_v6 = vpack.c.bf16 %v1085_v1, %v1083_v7  ;;  %v3366_v61 = vpop.eup %3365 }
 0x362   :  { %2996 = vst [vmem:[#allocation12 + $0x10] sm:$0xff] %v2928_v24   ;;  %3003 = vst [vmem:[#allocation12 + $0x48] sm:$0xff] %v2963_v13   ;;  %v4617_v45 = vmul.f32 %v3366_v61, %v4829_v32 }
 0x363   :  { %v1879_v3 = vpop.trf.xlu0  ;;  %v2517_v18 = vpop.trf.xlu1  ;;  %1287 = vst [vmem:[#allocation14 + $0x38] sm:$0xff] %v3017_v31  ;;  %1295 = vst [vmem:[#allocation14 + $0x78] sm:$0xff] %v3025_v6 }
 0x364   :  { %2283 = vrot.lane.b32.xlu0 %v4607_v14, %s3563_s3 }
 0x367   :  { %v1880_v63 = vpop.trf.xlu0  ;;  %v2518_v12 = vpop.trf.xlu1 }
 0x368   :  { %2285 = vrot.lane.b32.xlu0 %v4612_v48, %s3563_s3  ;;  %v2933_v46 = vpack.c.bf16 %v1880_v63, %v1879_v3  ;;  %v2968_v57 = vpack.c.bf16 %v2518_v12, %v2517_v18 }
 0x36a   :  { %2997 = vst [vmem:[#allocation12 + $0x18] sm:$0xff] %v2933_v46   ;;  %3004 = vst [vmem:[#allocation12 + $0x50] sm:$0xff] %v2968_v57  }
 0x36b   :  { %v1881_v22 = vpop.trf.xlu0  ;;  %v2519_v24 = vpop.trf.xlu1 }
 0x36c   :  { %2287 = vrot.lane.b32.xlu0 %v4617_v45, %s3563_s3 }
 0x36f   :  { %v1882_v13 = vpop.trf.xlu0  ;;  %v2520_v38 = vpop.trf.xlu1 }
 0x370   :  { %v2938_v51 = vpack.c.bf16 %v1882_v13, %v1881_v22  ;;  %v2973_v0 = vpack.c.bf16 %v2520_v38, %v2519_v24 }
 0x372   :  { %2998 = vst [vmem:[#allocation12 + $0x20] sm:$0xff] %v2938_v51   ;;  %3005 = vst [vmem:[#allocation12 + $0x58] sm:$0xff] %v2973_v0  }
 0x373   :  { %v1883_v19 = vpop.trf.xlu0  ;;  %v2521_v54 = vpop.trf.xlu1 }
 0x377   :  { %v1884_v26 = vpop.trf.xlu0  ;;  %v2522_v7 = vpop.trf.xlu1 }
 0x378   :  { %v2943_v20 = vpack.c.bf16 %v1884_v26, %v1883_v19  ;;  %v2978_v3 = vpack.c.bf16 %v2522_v7, %v2521_v54 }
 0x37a   :  { %2999 = vst [vmem:[#allocation12 + $0x28] sm:$0xff] %v2943_v20   ;;  %3006 = vst [vmem:[#allocation12 + $0x60] sm:$0xff] %v2978_v3  }
 0x37b   :  { %v1885_v18 = vpop.trf.xlu0  ;;  %v2523_v17 = vpop.trf.xlu1 }
 0x37f   :  { %v1886_v59 = vpop.trf.xlu0  ;;  %v2524_v21 = vpop.trf.xlu1 }
 0x380   :  { %v2948_v1 = vpack.c.bf16 %v1886_v59, %v1885_v18  ;;  %v2983_v31 = vpack.c.bf16 %v2524_v21, %v2523_v17 }
 0x382   :  { %3000 = vst [vmem:[#allocation12 + $0x30] sm:$0xff] %v2948_v1   ;;  %3007 = vst [vmem:[#allocation12 + $0x68] sm:$0xff] %v2983_v31  }
 0x383   :  { %v1887_v6 = vpop.trf.xlu0  ;;  %v2525_v27 = vpop.trf.xlu1 }
 0x387   :  { %v1888_v61 = vpop.trf.xlu0  ;;  %v2526_v63 = vpop.trf.xlu1 }
 0x388   :  { %v2953_v12 = vpack.c.bf16 %v1888_v61, %v1887_v6  ;;  %v2988_v46 = vpack.c.bf16 %v2526_v63, %v2525_v27 }
 0x38a   :  { %3001 = vst [vmem:[#allocation12 + $0x38] sm:$0xff] %v2953_v12   ;;  %3008 = vst [vmem:[#allocation12 + $0x70] sm:$0xff] %v2988_v46  }
 0x38b   :  { %v2527_v57 = vpop.trf.xlu1 }
 0x38f   :  { %v2528_v32 = vpop.trf.xlu1 }
 0x390   :  { %v2993_v22 = vpack.c.bf16 %v2528_v32, %v2527_v57 }
 0x392   :  { %3009 = vst [vmem:[#allocation12 + $0x78] sm:$0xff] %v2993_v22  }
 0x393   :  { %3490 = shalt.err (!%p3487_p8)
}
 0x394   :  { %s3491_s30 = scalar_lea.hbm %s4715_s5, 2048 }
 0x395   :  { %p3492_p9 = scmp.ne.s32.totalorder %s4715_s5, %s3491_s30  ;;  %p3495_p10 = scmp.lt.u32.totalorder %s3491_s30, %s4715_s5 }
 0x397   :  { %p3497_p11 = pnand %p3495_p10, %p3492_p9 }
 0x399   :  { %3500 = shalt.err (!%p3497_p11)
}
 0x39a   :  { %s3566_s0 = smov 4   ;;  %s3501_s13 = scalar_lea.vmem %s4621_s26, 2048 }
 0x39b   :  { %2632 = dma.vmem_to_hbm [thread:$0]  %s2627_s24, 2048, %s4715_s5, [#allocation13], %s3563_s3, %s3563_s3, %s3566_s0  }
 0x39c   :  { %p3502_p12 = scmp.ne.s32.totalorder %s4621_s26, %s3501_s13  ;;  %p3506_p13 = scmp.lt.s32.totalorder %s4621_s26, %s4621_s26 }
 0x39d   :  { %p3507_p0 = scmp.lt.s32.totalorder %s3501_s13, %s3501_s13 }
 0x39f   :  { %p3508_p1 = por %p3507_p0, %p3506_p13 }
 0x3a1   :  { %p3509_p2 = pnand %p3508_p1, %p3502_p12 }
 0x3a3   :  { %3512 = shalt.err (!%p3509_p2)
}
 0x3a4   :  { %s3513_s16 = scalar_lea.hbm %s4716_s6, 2048 }
 0x3a5   :  { %p3514_p3 = scmp.ne.s32.totalorder %s4716_s6, %s3513_s16  ;;  %p3517_p4 = scmp.lt.u32.totalorder %s3513_s16, %s4716_s6 }
 0x3a7   :  { %p3519_p5 = pnand %p3517_p4, %p3514_p3 }
 0x3a9   :  { %3522 = shalt.err (!%p3519_p5)
}
 0x3aa   :  { %2644 = dma.vmem_to_hbm [thread:$0]  %s4621_s26, 2048, %s4716_s6, [#allocation13], %s3559_s1, %s3559_s1, %s3560_s21   ;;  %v2258_v24 = vpop.permute.xlu0 %2257  ;;  %v3381_v13 = vld [vmem:[#allocation8] sm:$0xff]  ;;  %v3383_v7 = vld [vmem:[#allocation8 + $0x8] sm:$0xff]  ;;  %v3385_v31 = vld [vmem:[#allocation8 + $0x10] sm:$0xff] }
 0x3ab   :  { %v2241_v38 = vmul.f32 %v3381_v13, %v4532_v34  ;;  %v3382_v51 = vld [vmem:[#allocation9] sm:$0xff]  ;;  %v2242_v20 = vmul.f32 %v3383_v7, %v4538_v15  ;;  %v3384_v3 = vld [vmem:[#allocation9 + $0x8] sm:$0xff]  ;;  %v2243_v6 = vmul.f32 %v3385_v31, %v4544_v23  ;;  %v3386_v27 = vld [vmem:[#allocation9 + $0x10] sm:$0xff]  ;;  %v2244_v15 = vmul.f32 %v4550_v29, %v4352_v33  ;;  %s3567_s6 = smov [#allocation11]  }
 0x3ac   :  { %v2289_v0 = vmul.f32 %v3382_v51, %v2258_v24  ;;  %v3388_v51 = vld [vmem:[#allocation9 + $0x20] sm:$0xff]  ;;  %v2246_v33 = vmul.f32 %v4562_v11, %v4379_v47  ;;  %v2248_v47 = vmul.f32 %v4574_v10, %v4405_v44  ;;  %v2250_v44 = vmul.f32 %v4586_v16, %v4434_v42  ;;  %s2614_s22 = sshll.u32 %s3567_s6, 4  ;;  %s2615_s22 = int_to_ptr.vmem [resolvable:$true] %s2614_s22 }
 0x3ad   :  { %v2252_v42 = vmul.f32 %v4597_v60, %v4466_v39  ;;  %v2254_v39 = vmul.f32 %v4607_v14, %v4492_v50  ;;  %v2256_v50 = vmul.f32 %v4617_v45, %v4509_v25  ;;  %s3523_s3 = scalar_lea.vmem %s2615_s22, 2048  ;;  %p3528_p7 = scmp.lt.s32.totalorder %s2615_s22, %s2615_s22 }
 0x3ae   :  { %v2305_v19 = vadd.f32 %v2289_v0, %v2241_v38  ;;  %v2260_v54 = vpop.permute.xlu0 %2259  ;;  %v3387_v38 = vld [vmem:[#allocation8 + $0x20] sm:$0xff]  ;;  %p3524_p6 = scmp.ne.s32.totalorder %s2615_s22, %s3523_s3  ;;  %p3529_p8 = scmp.lt.s32.totalorder %s3523_s3, %s3523_s3 }
 0x3af   :  { %v2290_v18 = vmul.f32 %v3384_v3, %v2260_v54  ;;  %v2245_v23 = vmul.f32 %v3387_v38, %v4556_v2 }
 0x3b0   :  { %v2401_v26 = vmul.f32 0.088388346, %v2305_v19  ;;  %p3530_p9 = por %p3529_p8, %p3528_p7 }
 0x3b1   :  { %v2306_v59 = vadd.f32 %v2290_v18, %v2242_v20 }
 0x3b2   :  { %v2883_v17 = vpack.c.bf16 %v2401_v26, %v2401_v26  ;;  %v2262_v21 = vpop.permute.xlu0 %2261  ;;  %p3531_p10 = pnand %p3530_p9, %p3524_p6 }
 0x3b3   :  { %v2402_v1 = vmul.f32 0.088388346, %v2306_v59  ;;  %v2291_v34 = vmul.f32 %v3386_v27, %v2262_v21  ;;  %v3390_v59 = vld [vmem:[#allocation9 + $0x30] sm:$0xff] }
 0x3b4   :  { %2481 = vst [vmem:[#allocation11 + $0x4] sm:$0xf] %v2883_v17  ;;  %v3389_v17 = vld [vmem:[#allocation8 + $0x30] sm:$0xff] }
 0x3b5   :  { %v2884_v61 = vpack.c.bf16 %v2402_v1, %v2402_v1  ;;  %v2307_v63 = vadd.f32 %v2291_v34, %v2243_v6  ;;  %v2247_v2 = vmul.f32 %v3389_v17, %v4568_v53  ;;  %v2249_v53 = vmul.f32 %v4580_v49, %v4372_v5 }
 0x3b6   :  { %v2264_v12 = vpop.permute.xlu0 %2263  ;;  %v2251_v5 = vmul.f32 %v4592_v36, %v4426_v9  ;;  %v2253_v9 = vmul.f32 %v4602_v37, %v4451_v30  ;;  %v2255_v30 = vmul.f32 %v4612_v48, %v4471_v62 }
 0x3b7   :  { %2482 = vst [vmem:[#allocation11 + $0xc] sm:$0xf] %v2884_v61  ;;  %v2403_v46 = vmul.f32 0.088388346, %v2307_v63  ;;  %v2292_v57 = vmul.f32 %v2264_v12, %v4354_v58 }
 0x3b9   :  { %v2885_v32 = vpack.c.bf16 %v2403_v46, %v2403_v46  ;;  %v2308_v22 = vadd.f32 %v2292_v57, %v2244_v15 }
 0x3ba   :  { %v2266_v24 = vpop.permute.xlu0 %2265 }
 0x3bb   :  { %2483 = vst [vmem:[#allocation11 + $0x14] sm:$0xf] %v2885_v32  ;;  %v2404_v13 = vmul.f32 0.088388346, %v2308_v22  ;;  %v2293_v0 = vmul.f32 %v3388_v51, %v2266_v24 }
 0x3bd   :  { %v2886_v19 = vpack.c.bf16 %v2404_v13, %v2404_v13  ;;  %v2309_v54 = vadd.f32 %v2293_v0, %v2245_v23 }
 0x3be   :  { %v2268_v26 = vpop.permute.xlu0 %2267 }
 0x3bf   :  { %2484 = vst [vmem:[#allocation11 + $0x1c] sm:$0xf] %v2886_v19  ;;  %v2405_v7 = vmul.f32 0.088388346, %v2309_v54  ;;  %v2294_v58 = vmul.f32 %v2268_v26, %v4381_v35 }
 0x3c1   :  { %v2887_v29 = vpack.c.bf16 %v2405_v7, %v2405_v7  ;;  %v2310_v20 = vadd.f32 %v2294_v58, %v2246_v33 }
 0x3c2   :  { %v2270_v3 = vpop.permute.xlu0 %2269 }
 0x3c3   :  { %2485 = vst [vmem:[#allocation11 + $0x24] sm:$0xf] %v2887_v29  ;;  %v2406_v18 = vmul.f32 0.088388346, %v2310_v20  ;;  %v2295_v21 = vmul.f32 %v3390_v59, %v2270_v3 }
 0x3c5   :  { %v2888_v1 = vpack.c.bf16 %v2406_v18, %v2406_v18  ;;  %v2311_v31 = vadd.f32 %v2295_v21, %v2247_v2 }
 0x3c6   :  { %v2272_v6 = vpop.permute.xlu0 %2271 }
 0x3c7   :  { %2486 = vst [vmem:[#allocation11 + $0x2c] sm:$0xf] %v2888_v1  ;;  %v2407_v27 = vmul.f32 0.088388346, %v2311_v31  ;;  %v2296_v35 = vmul.f32 %v2272_v6, %v4401_v52 }
 0x3c9   :  { %v2889_v11 = vpack.c.bf16 %v2407_v27, %v2407_v27  ;;  %v2312_v34 = vadd.f32 %v2296_v35, %v2248_v47 }
 0x3ca   :  { %v2274_v61 = vpop.permute.xlu0 %2273 }
 0x3cb   :  { %2487 = vst [vmem:[#allocation11 + $0x34] sm:$0xf] %v2889_v11  ;;  %v2408_v63 = vmul.f32 0.088388346, %v2312_v34  ;;  %v2297_v12 = vmul.f32 %v2274_v61, %v4374_v56 }
 0x3cd   :  { %v2890_v46 = vpack.c.bf16 %v2408_v63, %v2408_v63  ;;  %v2313_v15 = vadd.f32 %v2297_v12, %v2249_v53 }
 0x3ce   :  { %v2276_v57 = vpop.permute.xlu0 %2275 }
 0x3cf   :  { %2488 = vst [vmem:[#allocation11 + $0x3c] sm:$0xf] %v2890_v46  ;;  %v2409_v32 = vmul.f32 0.088388346, %v2313_v15  ;;  %v2298_v52 = vmul.f32 %v2276_v57, %v4430_v40 }
 0x3d1   :  { %v2891_v10 = vpack.c.bf16 %v2409_v32, %v2409_v32  ;;  %v2314_v22 = vadd.f32 %v2298_v52, %v2250_v44 }
 0x3d2   :  { %v2278_v24 = vpop.permute.xlu0 %2277 }
 0x3d3   :  { %2489 = vst [vmem:[#allocation11 + $0x44] sm:$0xf] %v2891_v10  ;;  %v2410_v13 = vmul.f32 0.088388346, %v2314_v22  ;;  %v2299_v56 = vmul.f32 %v2278_v24, %v4428_v28 }
 0x3d5   :  { %v2892_v49 = vpack.c.bf16 %v2410_v13, %v2410_v13  ;;  %v2315_v38 = vadd.f32 %v2299_v56, %v2251_v5 }
 0x3d6   :  { %v2280_v23 = vpop.permute.xlu0 %2279 }
 0x3d7   :  { %2490 = vst [vmem:[#allocation11 + $0x4c] sm:$0xf] %v2892_v49  ;;  %v2411_v51 = vmul.f32 0.088388346, %v2315_v38  ;;  %v2300_v40 = vmul.f32 %v2280_v23, %v4462_v43 }
 0x3d9   :  { %v2893_v16 = vpack.c.bf16 %v2411_v51, %v2411_v51  ;;  %v2316_v0 = vadd.f32 %v2300_v40, %v2252_v42 }
 0x3da   :  { %v2282_v19 = vpop.permute.xlu0 %2281 }
 0x3db   :  { %2491 = vst [vmem:[#allocation11 + $0x54] sm:$0xf] %v2893_v16  ;;  %v2412_v54 = vmul.f32 0.088388346, %v2316_v0  ;;  %v2301_v28 = vmul.f32 %v2282_v19, %v4453_v4 }
 0x3dd   :  { %v2894_v36 = vpack.c.bf16 %v2412_v54, %v2412_v54  ;;  %v2317_v26 = vadd.f32 %v2301_v28, %v2253_v9 }
 0x3de   :  { %v2284_v7 = vpop.permute.xlu0 %2283 }
 0x3df   :  { %2492 = vst [vmem:[#allocation11 + $0x5c] sm:$0xf] %v2894_v36  ;;  %v2413_v33 = vmul.f32 0.088388346, %v2317_v26  ;;  %v2302_v43 = vmul.f32 %v2284_v7, %v4490_v41 }
 0x3e1   :  { %v2895_v60 = vpack.c.bf16 %v2413_v33, %v2413_v33  ;;  %v2318_v58 = vadd.f32 %v2302_v43, %v2254_v39 }
 0x3e2   :  { %v2286_v29 = vpop.permute.xlu0 %2285 }
 0x3e3   :  { %2493 = vst [vmem:[#allocation11 + $0x64] sm:$0xf] %v2895_v60  ;;  %v2414_v20 = vmul.f32 0.088388346, %v2318_v58  ;;  %v2303_v4 = vmul.f32 %v2286_v29, %v4473_v55 }
 0x3e5   :  { %v2896_v37 = vpack.c.bf16 %v2414_v20, %v2414_v20  ;;  %v2319_v3 = vadd.f32 %v2303_v4, %v2255_v30 }
 0x3e6   :  { %v2288_v18 = vpop.permute.xlu0 %2287 }
 0x3e7   :  { %2494 = vst [vmem:[#allocation11 + $0x6c] sm:$0xf] %v2896_v37  ;;  %v2415_v17 = vmul.f32 0.088388346, %v2319_v3  ;;  %v2304_v41 = vmul.f32 %v2288_v18, %v4511_v8 }
 0x3e9   :  { %v2897_v14 = vpack.c.bf16 %v2415_v17, %v2415_v17  ;;  %v2320_v2 = vadd.f32 %v2304_v41, %v2256_v50 }
 0x3eb   :  { %2495 = vst [vmem:[#allocation11 + $0x74] sm:$0xf] %v2897_v14  ;;  %v2416_v59 = vmul.f32 0.088388346, %v2320_v2 }
 0x3ed   :  { %v2898_v21 = vpack.c.bf16 %v2416_v59, %v2416_v59 }
 0x3ef   :  { %2496 = vst [vmem:[#allocation11 + $0x7c] sm:$0xf] %v2898_v21 }
 0x3f0   :  { %3534 = shalt.err (!%p3531_p10)
}
 0x3f1   :  { %s3535_s25 = scalar_lea.hbm %s4714_s4, 2048 }
 0x3f2   :  { %p3536_p11 = scmp.ne.s32.totalorder %s4714_s4, %s3535_s25  ;;  %p3539_p12 = scmp.lt.u32.totalorder %s3535_s25, %s4714_s4 }
 0x3f4   :  { %p3541_p13 = pnand %p3539_p12, %p3536_p11 }
 0x3f6   :  { %3544 = shalt.err (!%p3541_p13)
}
 0x3f7   :  { %2620 = dma.vmem_to_hbm [thread:$0]  %s2615_s22, 2048, %s4714_s4, [#allocation5], %s3559_s1, %s3559_s1, %s3560_s21  }
 0x3f8   :  { %3551 = dma.done.wait [#allocation5], 2048  }
 0x3f9   :  { %3552 = vsyncadd [#allocation5], 4294965248 }
 0x3fa   :  { %3553 = dma.done.wait [#allocation13], 4096  }
 0x3fb   :  { %3554 = vsyncadd [#allocation13], 4294963200 }
 0x3fc   :  { %2654 = vsyncpa [#allocation4], 1 }
 0x3fd   :  { %2655 = vsyncpa [#allocation7], 1 }
 0x3fe   :  { %2656 = vsyncpa [#allocation10], 1 }
 0x3ff   :  { %2657 = vsyncpa [#allocation5], 1 }
 0x400   :  { %2658 = vsyncpa [#allocation13], 1 }

</bundles_post_ra>
